<compile_context>
chip_gen: v7x
topology: tpu7x:2x2x1
jax: 0.10.0
libtpu: 0.0.40
codegen_flags: <defaults>
</compile_context>

<pallas_src>
import functools

import jax
import jax.numpy as jnp
from jax.experimental import pallas as pl
from jax.experimental.pallas import tpu as pltpu


# ----------------------------------------------------------------------------
# Pallas kernels
# ----------------------------------------------------------------------------
def _vmem_spec():
    return pl.BlockSpec(memory_space=pltpu.MemorySpace.VMEM)


def _conv_mm_kernel(x_ref, w_ref, b_ref, o_ref):
    """o = relu(x @ w + b); all operands fully resident in VMEM."""
    acc = jnp.dot(x_ref[...], w_ref[...], preferred_element_type=jnp.float32)
    o_ref[...] = jnp.maximum(acc + b_ref[...], 0.0).astype(o_ref.dtype)


def _conv_matmul_relu(patches, wm, b2d):
    """patches:(M,K) f32, wm:(K,N) f32, b2d:(1,N) f32 -> relu(patches@wm+b) (M,N).

    Unpadded full-array blocks: Mosaic pads to (8,128) tiles in VMEM, so no
    HBM padding copies are materialized.
    """
    M, _ = patches.shape
    N = wm.shape[1]
    return pl.pallas_call(
        _conv_mm_kernel,
        out_shape=jax.ShapeDtypeStruct((M, N), jnp.float32),
        in_specs=[_vmem_spec()] * 3,
        out_specs=_vmem_spec(),
    )(patches, wm, b2d)


def _head_kernel(p3_ref, w3_ref, b3_ref, act_ref, w1p_ref, w1a_ref, b1_ref,
                 w2_ref, b2_ref, wq_ref, bq_ref, o_ref, *, n_pos, batch):
    """Fused conv3 + fc1 + fc2 + q_out.

    p3_ref : (n_pos*batch, 9*C2) conv3 im2col patches, rows ordered (pos, b).
    w1p_ref: (n_pos, C3, 256)  fc1 weights for the conv part, already permuted
             so the torch NCHW flatten order (c-major) is honored.
    """
    # conv3 + ReLU
    a3 = jnp.dot(p3_ref[...], w3_ref[...], preferred_element_type=jnp.float32)
    a3 = jnp.maximum(a3 + b3_ref[...], 0.0)                     # (P*B, C3)

    # fc1 = action part + sum over conv3 output positions of per-position matmuls
    h = jnp.dot(act_ref[...], w1a_ref[...], preferred_element_type=jnp.float32)
    h = h + b1_ref[...]
    for p in range(n_pos):                                      # static unroll
        h = h + jnp.dot(a3[p * batch:(p + 1) * batch, :], w1p_ref[p],
                        preferred_element_type=jnp.float32)
    h = jnp.maximum(h, 0.0)                                     # (B, 256)

    # fc2 + ReLU
    h = jnp.dot(h, w2_ref[...], preferred_element_type=jnp.float32) + b2_ref[...]
    h = jnp.maximum(h, 0.0)                                     # (B, 128)

    # q head (N=1): VPU multiply + lane reduction, no padded MXU matmul.
    q = jnp.sum(h * wq_ref[...], axis=-1, keepdims=True) + bq_ref[...]
    o_ref[...] = q.astype(o_ref.dtype)                          # (B, 1)


# ----------------------------------------------------------------------------
# XLA glue: channels-last im2col (patch columns ordered (kh, kw, cin))
# ----------------------------------------------------------------------------
def _im2col_nhwc(x, k, stride):
    """x: (B, H, W, C) -> patches (B, OH, OW, k*k*C), column order (kh, kw, c)."""
    B, H, W, C = x.shape
    OH = (H - k) // stride + 1
    OW = (W - k) // stride + 1
    cols = []
    for di in range(k):
        for dj in range(k):
            cols.append(x[:, di:di + stride * OH:stride,
                            dj:dj + stride * OW:stride, :])     # (B, OH, OW, C)
    p = jnp.concatenate(cols, axis=-1)                          # (B, OH, OW, k*k*C)
    return p, OH, OW


# ----------------------------------------------------------------------------
# Params: torch-layout init + one-time matmul-ready preparation (hoisted)
# ----------------------------------------------------------------------------
def _conv_out_dim(d, k, s):
    return (d - k) // s + 1


def conv_stack_output_hw(input_shape):
    h, w = input_shape
    h, w = _conv_out_dim(h, 5, 2), _conv_out_dim(w, 5, 2)
    h, w = _conv_out_dim(h, 3, 2), _conv_out_dim(w, 3, 2)
    h, w = _conv_out_dim(h, 3, 2), _conv_out_dim(w, 3, 2)
    return h, w


def init_params(key, input_shape=(30, 30), action_dim=4):
    """Torch-layout parameters (Conv2d OIHW, Linear (out, in))."""
    oh3, ow3 = conv_stack_output_hw(input_shape)
    conv_out_size = 64 * oh3 * ow3
    ks = jax.random.split(key, 12)
    scale = 0.1
    return {
        "w1": scale * jax.random.normal(ks[0], (16, 1, 5, 5), jnp.float32),
        "b1": scale * jax.random.normal(ks[1], (16,), jnp.float32),
        "w2": scale * jax.random.normal(ks[2], (32, 16, 3, 3), jnp.float32),
        "b2": scale * jax.random.normal(ks[3], (32,), jnp.float32),
        "w3": scale * jax.random.normal(ks[4], (64, 32, 3, 3), jnp.float32),
        "b3": scale * jax.random.normal(ks[5], (64,), jnp.float32),
        "fc1_w": scale * jax.random.normal(ks[6], (256, conv_out_size + action_dim), jnp.float32),
        "fc1_b": scale * jax.random.normal(ks[7], (256,), jnp.float32),
        "fc2_w": scale * jax.random.normal(ks[8], (128, 256), jnp.float32),
        "fc2_b": scale * jax.random.normal(ks[9], (128,), jnp.float32),
        "q_w": scale * jax.random.normal(ks[10], (1, 128), jnp.float32),
        "q_b": scale * jax.random.normal(ks[11], (1,), jnp.float32),
    }


def prepare_params(params, input_shape=(30, 30)):
    """One-time (outside the forward) conversion of torch-layout params into
    matmul-ready tensors: conv weights -> (kh*kw*Cin, Cout); fc weights
    pre-transposed; fc1 conv-part columns permuted so the kernel's
    (position, batch) activation layout reproduces torch's x.view(B, -1)
    (c, h, w) flatten order; biases as (1, N) rows."""
    oh3, ow3 = conv_stack_output_hw(input_shape)
    n_pos = oh3 * ow3
    c3 = params["w3"].shape[0]

    def conv_w(w):  # (Cout, Cin, kh, kw) -> (kh*kw*Cin, Cout), (kh,kw,cin)-major rows
        cout, cin, kh, kw = w.shape
        return jnp.transpose(w, (2, 3, 1, 0)).reshape(kh * kw * cin, cout)

    fc1_w = params["fc1_w"]                       # (256, c3*n_pos + A)
    conv_out = c3 * n_pos
    w1_conv = fc1_w[:, :conv_out].reshape(fc1_w.shape[0], c3, n_pos)   # [out, c, p]

    return {
        "w1m": conv_w(params["w1"]), "b1": params["b1"].reshape(1, -1),
        "w2m": conv_w(params["w2"]), "b2": params["b2"].reshape(1, -1),
        "w3m": conv_w(params["w3"]), "b3": params["b3"].reshape(1, -1),
        "w1p": jnp.transpose(w1_conv, (2, 1, 0)),  # (n_pos, c3, 256)
        "w1a": fc1_w[:, conv_out:].T,              # (A, 256)
        "b_fc1": params["fc1_b"].reshape(1, -1),
        "w2f": params["fc2_w"].T,                  # (256, 128)
        "b_fc2": params["fc2_b"].reshape(1, -1),
        "wq": params["q_w"].reshape(1, -1),        # (1, 128)
        "bq": params["q_b"].reshape(1, 1),         # (1, 1)
    }


# ----------------------------------------------------------------------------
# Forward pass
# ----------------------------------------------------------------------------
def hybrid_q_forward(prepped, state, action):
    """state: (B, 1, H, W) NCHW (torch layout), action: (B, A) -> q_val (B, 1)."""
    B = state.shape[0]
    x = jnp.transpose(state, (0, 2, 3, 1))               # NHWC (C=1: free relabel)

    # conv1 + ReLU  (Pallas matmul kernel on im2col patches)
    p1, oh1, ow1 = _im2col_nhwc(x, 5, 2)
    c1 = prepped["w1m"].shape[1]
    a1 = _conv_matmul_relu(p1.reshape(B * oh1 * ow1, -1), prepped["w1m"], prepped["b1"])
    a1 = a1.reshape(B, oh1, ow1, c1)                     # channels-last, no transpose

    # conv2 + ReLU
    p2, oh2, ow2 = _im2col_nhwc(a1, 3, 2)
    c2 = prepped["w2m"].shape[1]
    a2 = _conv_matmul_relu(p2.reshape(B * oh2 * ow2, -1), prepped["w2m"], prepped["b2"])
    a2 = a2.reshape(B, oh2, ow2, c2)

    # conv3 patches, rows reordered to (position, batch) for the fused head kernel.
    p3, oh3, ow3 = _im2col_nhwc(a2, 3, 2)
    n_pos = oh3 * ow3
    k3 = p3.shape[-1]
    p3 = p3.reshape(B, n_pos, k3).transpose(1, 0, 2).reshape(n_pos * B, k3)

    # Fused conv3 + fc1 + fc2 + q_out in ONE pallas_call.
    kernel = functools.partial(_head_kernel, n_pos=n_pos, batch=B)
    q_val = pl.pallas_call(
        kernel,
        out_shape=jax.ShapeDtypeStruct((B, 1), jnp.float32),
        in_specs=[_vmem_spec()] * 11,
        out_specs=_vmem_spec(),
    )(p3, prepped["w3m"], prepped["b3"], action,
      prepped["w1p"], prepped["w1a"], prepped["b_fc1"],
      prepped["w2f"], prepped["b_fc2"], prepped["wq"], prepped["bq"])
    return q_val


# ----------------------------------------------------------------------------
# Pure-JAX reference (torch semantics) for a correctness sanity check
# ----------------------------------------------------------------------------
def _ref_forward(params, state, action):
    hi = jax.lax.Precision.HIGHEST
    x = state
    for wi, bi in (("w1", "b1"), ("w2", "b2"), ("w3", "b3")):
        x = jax.lax.conv_general_dilated(
            x, params[wi], window_strides=(2, 2), padding="VALID",
            dimension_numbers=("NCHW", "OIHW", "NCHW"), precision=hi)
        x = jax.nn.relu(x + params[bi][None, :, None, None])
    x = x.reshape(x.shape[0], -1)                        # torch view(B, -1): (c,h,w)
    x = jnp.concatenate([x, action], axis=1)
    x = jax.nn.relu(jnp.dot(x, params["fc1_w"].T, precision=hi) + params["fc1_b"])
    x = jax.nn.relu(jnp.dot(x, params["fc2_w"].T, precision=hi) + params["fc2_b"])
    return jnp.dot(x, params["q_w"].T, precision=hi) + params["q_b"]


if __name__ == "__main__":
    key = jax.random.PRNGKey(0)
    k_params, k_state, k_action = jax.random.split(key, 3)

    # Small shapes consistent with the module: input_shape=(30, 30), action_dim=4.
    B, H, W, A = 2, 30, 30, 4
    params = init_params(k_params, input_shape=(H, W), action_dim=A)
    prepped = prepare_params(params, input_shape=(H, W))   # one-time weight prep

    state = jax.random.normal(k_state, (B, 1, H, W), jnp.float32)
    action = jax.random.normal(k_action, (B, A), jnp.float32)

    fwd = jax.jit(hybrid_q_forward)
    q = jax.block_until_ready(fwd(prepped, state, action))
    assert q.shape == (B, 1), q.shape

    q_ref = jax.block_until_ready(jax.jit(_ref_forward)(params, state, action))
    max_err = float(jnp.max(jnp.abs(q - q_ref)))
    assert max_err < 1e-3, f"mismatch vs reference: {max_err}"

    print("KERNEL_OK")
</pallas_src>

<mosaic_0001>
module attributes {stable_mosaic.version = 11 : i64} {
  func.func @_conv_mm_kernel(%arg0: memref<338x25xf32, #tpu.memory_space<vmem>>, %arg1: memref<25x16xf32, #tpu.memory_space<vmem>>, %arg2: memref<1x16xf32, #tpu.memory_space<vmem>>, %arg3: memref<338x16xf32, #tpu.memory_space<vmem>>) attributes {dimension_semantics = [], scalar_prefetch = 0 : i64, scratch_operands = 0 : i64, tpu.core_type = #tpu.core_type<tc>} {
    %c0 = arith.constant 0 : index
    %c0_0 = arith.constant 0 : index
    %0 = vector.load %arg0[%c0, %c0_0] : memref<338x25xf32, #tpu.memory_space<vmem>>, vector<338x25xf32>
    %c0_1 = arith.constant 0 : index
    %c0_2 = arith.constant 0 : index
    %1 = vector.load %arg1[%c0_1, %c0_2] : memref<25x16xf32, #tpu.memory_space<vmem>>, vector<25x16xf32>
    %cst = arith.constant dense<0.000000e+00> : vector<338x16xf32>
    %2 = tpu.matmul %0, %1, %cst {dimension_numbers = #tpu.dot_dimension_numbers<[1], [0], [0], [1], [0, 0, 1, 1], [], []>} : vector<338x25xf32>, vector<25x16xf32>, vector<338x16xf32> -> vector<338x16xf32>
    %c0_3 = arith.constant 0 : index
    %c0_4 = arith.constant 0 : index
    %3 = vector.load %arg2[%c0_3, %c0_4] : memref<1x16xf32, #tpu.memory_space<vmem>>, vector<1x16xf32>
    %4 = vector.broadcast %3 : vector<1x16xf32> to vector<338x16xf32>
    %5 = arith.addf %2, %4 : vector<338x16xf32>
    %cst_5 = arith.constant 0.000000e+00 : f32
    %6 = vector.broadcast %cst_5 : f32 to vector<338x16xf32>
    %7 = arith.maximumf %5, %6 : vector<338x16xf32>
    %c0_6 = arith.constant 0 : index
    %c0_7 = arith.constant 0 : index
    %8 = vector.load %arg3[%c0_6, %c0_7] : memref<338x16xf32, #tpu.memory_space<vmem>>, vector<338x16xf32>
    tpu.vector_store %arg3[%c0_6, %c0_7], %7 {strides = array<i32>} : memref<338x16xf32, #tpu.memory_space<vmem>>, vector<338x16xf32>,
    return
  }
}

module attributes {stable_mosaic.version = 11 : i64} {
  func.func @_conv_mm_kernel(%arg0: memref<72x144xf32, #tpu.memory_space<vmem>>, %arg1: memref<144x32xf32, #tpu.memory_space<vmem>>, %arg2: memref<1x32xf32, #tpu.memory_space<vmem>>, %arg3: memref<72x32xf32, #tpu.memory_space<vmem>>) attributes {dimension_semantics = [], scalar_prefetch = 0 : i64, scratch_operands = 0 : i64, tpu.core_type = #tpu.core_type<tc>} {
    %c0 = arith.constant 0 : index
    %c0_0 = arith.constant 0 : index
    %0 = vector.load %arg0[%c0, %c0_0] : memref<72x144xf32, #tpu.memory_space<vmem>>, vector<72x144xf32>
    %c0_1 = arith.constant 0 : index
    %c0_2 = arith.constant 0 : index
    %1 = vector.load %arg1[%c0_1, %c0_2] : memref<144x32xf32, #tpu.memory_space<vmem>>, vector<144x32xf32>
    %cst = arith.constant dense<0.000000e+00> : vector<72x32xf32>
    %2 = tpu.matmul %0, %1, %cst {dimension_numbers = #tpu.dot_dimension_numbers<[1], [0], [0], [1], [0, 0, 1, 1], [], []>} : vector<72x144xf32>, vector<144x32xf32>, vector<72x32xf32> -> vector<72x32xf32>
    %c0_3 = arith.constant 0 : index
    %c0_4 = arith.constant 0 : index
    %3 = vector.load %arg2[%c0_3, %c0_4] : memref<1x32xf32, #tpu.memory_space<vmem>>, vector<1x32xf32>
    %4 = vector.broadcast %3 : vector<1x32xf32> to vector<72x32xf32>
    %5 = arith.addf %2, %4 : vector<72x32xf32>
    %cst_5 = arith.constant 0.000000e+00 : f32
    %6 = vector.broadcast %cst_5 : f32 to vector<72x32xf32>
    %7 = arith.maximumf %5, %6 : vector<72x32xf32>
    %c0_6 = arith.constant 0 : index
    %c0_7 = arith.constant 0 : index
    %8 = vector.load %arg3[%c0_6, %c0_7] : memref<72x32xf32, #tpu.memory_space<vmem>>, vector<72x32xf32>
    tpu.vector_store %arg3[%c0_6, %c0_7], %7 {strides = array<i32>} : memref<72x32xf32, #tpu.memory_space<vmem>>, vector<72x32xf32>,
    return
  }
}

module attributes {stable_mosaic.version = 11 : i64} {
  func.func @_head_kernel(%arg0: memref<8x288xf32, #tpu.memory_space<vmem>>, %arg1: memref<288x64xf32, #tpu.memory_space<vmem>>, %arg2: memref<1x64xf32, #tpu.memory_space<vmem>>, %arg3: memref<2x4xf32, #tpu.memory_space<vmem>>, %arg4: memref<4x64x256xf32, #tpu.memory_space<vmem>>, %arg5: memref<4x256xf32, #tpu.memory_space<vmem>>, %arg6: memref<1x256xf32, #tpu.memory_space<vmem>>, %arg7: memref<256x128xf32, #tpu.memory_space<vmem>>, %arg8: memref<1x128xf32, #tpu.memory_space<vmem>>, %arg9: memref<1x128xf32, #tpu.memory_space<vmem>>, %arg10: memref<1x1xf32, #tpu.memory_space<vmem>>, %arg11: memref<2x1xf32, #tpu.memory_space<vmem>>) attributes {dimension_semantics = [], scalar_prefetch = 0 : i64, scratch_operands = 0 : i64, tpu.core_type = #tpu.core_type<tc>} {
    %c0 = arith.constant 0 : index
    %c0_0 = arith.constant 0 : index
    %0 = vector.load %arg0[%c0, %c0_0] : memref<8x288xf32, #tpu.memory_space<vmem>>, vector<8x288xf32>
    %c0_1 = arith.constant 0 : index
    %c0_2 = arith.constant 0 : index
    %1 = vector.load %arg1[%c0_1, %c0_2] : memref<288x64xf32, #tpu.memory_space<vmem>>, vector<288x64xf32>
    %cst = arith.constant dense<0.000000e+00> : vector<8x64xf32>
    %2 = tpu.matmul %0, %1, %cst {dimension_numbers = #tpu.dot_dimension_numbers<[1], [0], [0], [1], [0, 0, 1, 1], [], []>} : vector<8x288xf32>, vector<288x64xf32>, vector<8x64xf32> -> vector<8x64xf32>
    %c0_3 = arith.constant 0 : index
    %c0_4 = arith.constant 0 : index
    %3 = vector.load %arg2[%c0_3, %c0_4] : memref<1x64xf32, #tpu.memory_space<vmem>>, vector<1x64xf32>
    %4 = vector.broadcast %3 : vector<1x64xf32> to vector<8x64xf32>
    %5 = arith.addf %2, %4 : vector<8x64xf32>
    %cst_5 = arith.constant 0.000000e+00 : f32
    %6 = vector.broadcast %cst_5 : f32 to vector<8x64xf32>
    %7 = arith.maximumf %5, %6 : vector<8x64xf32>
    %c0_6 = arith.constant 0 : index
    %c0_7 = arith.constant 0 : index
    %8 = vector.load %arg3[%c0_6, %c0_7] : memref<2x4xf32, #tpu.memory_space<vmem>>, vector<2x4xf32>
    %c0_8 = arith.constant 0 : index
    %c0_9 = arith.constant 0 : index
    %9 = vector.load %arg5[%c0_8, %c0_9] : memref<4x256xf32, #tpu.memory_space<vmem>>, vector<4x256xf32>
    %cst_10 = arith.constant dense<0.000000e+00> : vector<2x256xf32>
    %10 = tpu.matmul %8, %9, %cst_10 {dimension_numbers = #tpu.dot_dimension_numbers<[1], [0], [0], [1], [0, 0, 1, 1], [], []>} : vector<2x4xf32>, vector<4x256xf32>, vector<2x256xf32> -> vector<2x256xf32>
    %c0_11 = arith.constant 0 : index
    %c0_12 = arith.constant 0 : index
    %11 = vector.load %arg6[%c0_11, %c0_12] : memref<1x256xf32, #tpu.memory_space<vmem>>, vector<1x256xf32>
    %12 = vector.broadcast %11 : vector<1x256xf32> to vector<2x256xf32>
    %13 = arith.addf %10, %12 : vector<2x256xf32>
    %14 = vector.extract_strided_slice %7 {offsets = [0, 0], sizes = [2, 64], strides = [1, 1]} : vector<8x64xf32> to vector<2x64xf32>
    %c0_13 = arith.constant 0 : index
    %c0_14 = arith.constant 0 : index
    %c0_15 = arith.constant 0 : index
    %15 = vector.load %arg4[%c0_13, %c0_14, %c0_15] : memref<4x64x256xf32, #tpu.memory_space<vmem>>, vector<1x64x256xf32>
    %16 = vector.shape_cast %15 : vector<1x64x256xf32> to vector<64x256xf32>
    %cst_16 = arith.constant dense<0.000000e+00> : vector<2x256xf32>
    %17 = tpu.matmul %14, %16, %cst_16 {dimension_numbers = #tpu.dot_dimension_numbers<[1], [0], [0], [1], [0, 0, 1, 1], [], []>} : vector<2x64xf32>, vector<64x256xf32>, vector<2x256xf32> -> vector<2x256xf32>
    %18 = arith.addf %13, %17 : vector<2x256xf32>
    %19 = vector.extract_strided_slice %7 {offsets = [2, 0], sizes = [2, 64], strides = [1, 1]} : vector<8x64xf32> to vector<2x64xf32>
    %c1 = arith.constant 1 : index
    %c0_17 = arith.constant 0 : index
    %c0_18 = arith.constant 0 : index
    %20 = vector.load %arg4[%c1, %c0_17, %c0_18] : memref<4x64x256xf32, #tpu.memory_space<vmem>>, vector<1x64x256xf32>
    %21 = vector.shape_cast %20 : vector<1x64x256xf32> to vector<64x256xf32>
    %cst_19 = arith.constant dense<0.000000e+00> : vector<2x256xf32>
    %22 = tpu.matmul %19, %21, %cst_19 {dimension_numbers = #tpu.dot_dimension_numbers<[1], [0], [0], [1], [0, 0, 1, 1], [], []>} : vector<2x64xf32>, vector<64x256xf32>, vector<2x256xf32> -> vector<2x256xf32>
    %23 = arith.addf %18, %22 : vector<2x256xf32>
    %24 = vector.extract_strided_slice %7 {offsets = [4, 0], sizes = [2, 64], strides = [1, 1]} : vector<8x64xf32> to vector<2x64xf32>
    %c2 = arith.constant 2 : index
    %c0_20 = arith.constant 0 : index
    %c0_21 = arith.constant 0 : index
    %25 = vector.load %arg4[%c2, %c0_20, %c0_21] : memref<4x64x256xf32, #tpu.memory_space<vmem>>, vector<1x64x256xf32>
    %26 = vector.shape_cast %25 : vector<1x64x256xf32> to vector<64x256xf32>
    %cst_22 = arith.constant dense<0.000000e+00> : vector<2x256xf32>
    %27 = tpu.matmul %24, %26, %cst_22 {dimension_numbers = #tpu.dot_dimension_numbers<[1], [0], [0], [1], [0, 0, 1, 1], [], []>} : vector<2x64xf32>, vector<64x256xf32>, vector<2x256xf32> -> vector<2x256xf32>
    %28 = arith.addf %23, %27 : vector<2x256xf32>
    %29 = vector.extract_strided_slice %7 {offsets = [6, 0], sizes = [2, 64], strides = [1, 1]} : vector<8x64xf32> to vector<2x64xf32>
    %c3 = arith.constant 3 : index
    %c0_23 = arith.constant 0 : index
    %c0_24 = arith.constant 0 : index
    %30 = vector.load %arg4[%c3, %c0_23, %c0_24] : memref<4x64x256xf32, #tpu.memory_space<vmem>>, vector<1x64x256xf32>
    %31 = vector.shape_cast %30 : vector<1x64x256xf32> to vector<64x256xf32>
    %cst_25 = arith.constant dense<0.000000e+00> : vector<2x256xf32>
    %32 = tpu.matmul %29, %31, %cst_25 {dimension_numbers = #tpu.dot_dimension_numbers<[1], [0], [0], [1], [0, 0, 1, 1], [], []>} : vector<2x64xf32>, vector<64x256xf32>, vector<2x256xf32> -> vector<2x256xf32>
    %33 = arith.addf %28, %32 : vector<2x256xf32>
    %cst_26 = arith.constant 0.000000e+00 : f32
    %34 = vector.broadcast %cst_26 : f32 to vector<2x256xf32>
    %35 = arith.maximumf %33, %34 : vector<2x256xf32>
    %c0_27 = arith.constant 0 : index
    %c0_28 = arith.constant 0 : index
    %36 = vector.load %arg7[%c0_27, %c0_28] : memref<256x128xf32, #tpu.memory_space<vmem>>, vector<256x128xf32>
    %cst_29 = arith.constant dense<0.000000e+00> : vector<2x128xf32>
    %37 = tpu.matmul %35, %36, %cst_29 {dimension_numbers = #tpu.dot_dimension_numbers<[1], [0], [0], [1], [0, 0, 1, 1], [], []>} : vector<2x256xf32>, vector<256x128xf32>, vector<2x128xf32> -> vector<2x128xf32>
    %c0_30 = arith.constant 0 : index
    %c0_31 = arith.constant 0 : index
    %38 = vector.load %arg8[%c0_30, %c0_31] : memref<1x128xf32, #tpu.memory_space<vmem>>, vector<1x128xf32>
    %39 = vector.broadcast %38 : vector<1x128xf32> to vector<2x128xf32>
    %40 = arith.addf %37, %39 : vector<2x128xf32>
    %cst_32 = arith.constant 0.000000e+00 : f32
    %41 = vector.broadcast %cst_32 : f32 to vector<2x128xf32>
    %42 = arith.maximumf %40, %41 : vector<2x128xf32>
    %c0_33 = arith.constant 0 : index
    %c0_34 = arith.constant 0 : index
    %43 = vector.load %arg9[%c0_33, %c0_34] : memref<1x128xf32, #tpu.memory_space<vmem>>, vector<1x128xf32>
    %44 = vector.broadcast %43 : vector<1x128xf32> to vector<2x128xf32>
    %45 = arith.mulf %42, %44 : vector<2x128xf32>
    %cst_35 = arith.constant dense<0.000000e+00> : vector<2xf32>
    %46 = vector.multi_reduction <add>, %45, %cst_35 [1] : vector<2x128xf32> to vector<2xf32>
    %47 = vector.shape_cast %46 : vector<2xf32> to vector<2x1xf32>
    %c0_36 = arith.constant 0 : index
    %c0_37 = arith.constant 0 : index
    %48 = vector.load %arg10[%c0_36, %c0_37] : memref<1x1xf32, #tpu.memory_space<vmem>>, vector<1x1xf32>
    %49 = vector.broadcast %48 : vector<1x1xf32> to vector<2x1xf32>
    %50 = arith.addf %47, %49 : vector<2x1xf32>
    %c0_38 = arith.constant 0 : index
    %c0_39 = arith.constant 0 : index
    %51 = vector.load %arg11[%c0_38, %c0_39] : memref<2x1xf32, #tpu.memory_space<vmem>>, vector<2x1xf32>
    tpu.vector_store %arg11[%c0_38, %c0_39], %50 {strides = array<i32>} : memref<2x1xf32, #tpu.memory_space<vmem>>, vector<2x1xf32>,
    return
  }
}

</mosaic_0001>

<bundles_post_ra>
// kernel: hybrid_q_forward.3
= control target key start
LH: loop header
LB: loop body
LE: loop exit
PB: predicated region body
PF: predicated region fallthrough
CT: control target
= control target key end

     0   :  { %v818_v0 = vmov 0.0|0.0   ;;  %vm198_vm0 = vcmask 1040384   ;;  %vm819_vm1 = vmmov 0   ;;  %v820_v6 = vmov 0.0   ;;  %s1331_s1 = inlined_call_operand.vmem [shape: f32[25,16], index: 1, kind: input, shape index: {}]   ;;  %s1332_s0 = inlined_call_operand.vmem [shape: f32[338,25], index: 0, kind: input, shape index: {}]   ;;  %s1333_s2 = inlined_call_operand.vmem [shape: f32[1,16], index: 2, kind: input, shape index: {}]   ;;  %s1334_s3 = inlined_call_operand.vmem [shape: f32[338,16], index: 3, kind: output, shape index: {}]  }
   0x1   :  { %803 = vmatprep.subr.bf16.mxu0 %v818_v0  ;;  %v57_v1 = vld [vmem:[%s1331_s1] sm:$0xff]  ;;  %v58_v2 = vld [vmem:[%s1331_s1 + $0x8] sm:$0xff]  ;;  %810 = vmatprep.subr.bf16.mxu1 %v818_v0  ;;  %v59_v3 = vld [vmem:[%s1331_s1 + $0x10] sm:$0xff]  ;;  %vm821_vm2 = vmmov 1   ;;  %vm68_vm4 = vcmask 203776   ;;  %vm525_vm5 = vcmask 130048  }
   0x2   :  { %v804_v4 = vpack.c.bf16 %v58_v2, %v57_v1  ;;  %v60_v5 = vld [vmem:[%s1331_s1 + $0x18] sm:$0x1]  ;;  %674 = vmatprep.mubr.msk.f32.mxu0 %vm819_vm1, %v820_v6  ;;  %740 = vmatprep.mubr.msk.f32.mxu1 %vm819_vm1, %v820_v6  ;;  %vm808_vm3 = vmpackc.low %vm198_vm0, %vm821_vm2  ;;  %v14_v8 = vld [vmem:[%s1332_s0] sm:$0xff]  ;;  %vm568_vm6 = vcmask 123904  }
   0x3   :  { %v807_v7 = vpack.c.bf16 %v60_v5, %v59_v3  ;;  %v36_v9 = vld [vmem:[%s1332_s0 + $0xb0] sm:$0xff]  ;;  %v15_v10 = vld [vmem:[%s1332_s0 + $0x8] sm:$0xff]  ;;  %v37_v11 = vld [vmem:[%s1332_s0 + $0xb8] sm:$0xff] }
   0x4   :  { %805 = vmatpush3.bf16.msra.mxu0 %v804_v4  ;;  %812 = vmatpush3.bf16.msra.mxu1 %v804_v4  ;;  %v16_v12 = vld [vmem:[%s1332_s0 + $0x10] sm:$0xff]  ;;  %v38_v13 = vld [vmem:[%s1332_s0 + $0xc0] sm:$0xff]  ;;  %v17_v14 = vld [vmem:[%s1332_s0 + $0x18] sm:$0xff] }
   0x5   :  { %806 = vmatprep.subr.bf16.mxu0 %v818_v0  ;;  %811 = vmatprep.subr.bf16.mxu1 %v818_v0  ;;  %v39_v15 = vld [vmem:[%s1332_s0 + $0xc8] sm:$0xff]  ;;  %v18_v16 = vld [vmem:[%s1332_s0 + $0x20] sm:$0xff]  ;;  %v40_v17 = vld [vmem:[%s1332_s0 + $0xd0] sm:$0xff] }
   0x6   :  { %v19_v18 = vld [vmem:[%s1332_s0 + $0x28] sm:$0xff]  ;;  %v41_v19 = vld [vmem:[%s1332_s0 + $0xd8] sm:$0xff]  ;;  %v20_v20 = vld [vmem:[%s1332_s0 + $0x30] sm:$0xff] }
   0x7   :  { %v42_v21 = vld [vmem:[%s1332_s0 + $0xe0] sm:$0xff]  ;;  %v21_v22 = vld [vmem:[%s1332_s0 + $0x38] sm:$0xff]  ;;  %v43_v23 = vld [vmem:[%s1332_s0 + $0xe8] sm:$0xff] }
   0x8   :  { %809 = vmatpush3.bf16.msk.msra.mxu0 %vm808_vm3, %v807_v7  ;;  %813 = vmatpush3.bf16.msk.msra.mxu1 %vm808_vm3, %v807_v7  ;;  %v22_v24 = vld [vmem:[%s1332_s0 + $0x40] sm:$0xff]  ;;  %v44_v25 = vld [vmem:[%s1332_s0 + $0xf0] sm:$0xff]  ;;  %v23_v26 = vld [vmem:[%s1332_s0 + $0x48] sm:$0xff] }
   0x9   :  { %v45_v27 = vld [vmem:[%s1332_s0 + $0xf8] sm:$0xff]  ;;  %v24_v28 = vld [vmem:[%s1332_s0 + $0x50] sm:$0xff]  ;;  %v46_v29 = vld [vmem:[%s1332_s0 + $0x100] sm:$0xff] }
   0xa   :  { %v25_v30 = vld [vmem:[%s1332_s0 + $0x58] sm:$0xff]  ;;  %v47_v31 = vld [vmem:[%s1332_s0 + $0x108] sm:$0xff]  ;;  %v26_v32 = vld [vmem:[%s1332_s0 + $0x60] sm:$0xff] }
   0xb   :  { %675 = vmatmul.mubr.msk.f32.vlgmr.msra.gmra.mrb[0].mxu0 %vm68_vm4, %v14_v8  ;;  %741 = vmatmul.mubr.msk.f32.vlgmr.msra.gmra.mrb[0].mxu1 %vm68_vm4, %v36_v9  ;;  %v48_v33 = vld [vmem:[%s1332_s0 + $0x110] sm:$0xff]  ;;  %v27_v34 = vld [vmem:[%s1332_s0 + $0x68] sm:$0xff]  ;;  %v49_v35 = vld [vmem:[%s1332_s0 + $0x118] sm:$0xff] }
   0xc   :  { %677 = vmatprep.mubr.msk.f32.mxu0 %vm819_vm1, %v820_v6  ;;  %743 = vmatprep.mubr.msk.f32.mxu1 %vm819_vm1, %v820_v6  ;;  %v28_v36 = vld [vmem:[%s1332_s0 + $0x70] sm:$0xff]  ;;  %v50_v37 = vld [vmem:[%s1332_s0 + $0x120] sm:$0xff]  ;;  %v29_v38 = vld [vmem:[%s1332_s0 + $0x78] sm:$0xff] }
   0xd   :  { %v51_v39 = vld [vmem:[%s1332_s0 + $0x128] sm:$0xff]  ;;  %v30_v40 = vld [vmem:[%s1332_s0 + $0x80] sm:$0xff]  ;;  %v52_v41 = vld [vmem:[%s1332_s0 + $0x130] sm:$0xff] }
   0xe   :  { %v31_v42 = vld [vmem:[%s1332_s0 + $0x88] sm:$0xff]  ;;  %v53_v43 = vld [vmem:[%s1332_s0 + $0x138] sm:$0xff]  ;;  %v32_v44 = vld [vmem:[%s1332_s0 + $0x90] sm:$0xff] }
   0xf   :  { %678 = vmatmul.mubr.msk.f32.gmra.mrb[2].mxu0 %vm68_vm4, %v15_v10  ;;  %744 = vmatmul.mubr.msk.f32.gmra.mrb[2].mxu1 %vm68_vm4, %v37_v11  ;;  %v54_v45 = vld [vmem:[%s1332_s0 + $0x140] sm:$0xff]  ;;  %v33_v46 = vld [vmem:[%s1332_s0 + $0x98] sm:$0xff]  ;;  %v55_v47 = vld [vmem:[%s1332_s0 + $0x148] sm:$0xff] }
  0x10   :  { %680 = vmatprep.mubr.msk.f32.mxu0 %vm819_vm1, %v820_v6  ;;  %746 = vmatprep.mubr.msk.f32.mxu1 %vm819_vm1, %v820_v6  ;;  %v34_v48 = vld [vmem:[%s1332_s0 + $0xa0] sm:$0xff]  ;;  %v56_v49 = vld [vmem:[%s1332_s0 + $0x150] sm:$0x3]  ;;  %v35_v50 = vld [vmem:[%s1332_s0 + $0xa8] sm:$0xff] }
  0x11   :  { %v1115_v51 = vld [vmem:[%s1333_s2] ss:$0 sm:$0xff] }
  0x13   :  { %681 = vmatmul.mubr.msk.f32.gmra.mrb[4].mxu0 %vm68_vm4, %v16_v12  ;;  %747 = vmatmul.mubr.msk.f32.gmra.mrb[4].mxu1 %vm68_vm4, %v38_v13 }
  0x14   :  { %683 = vmatprep.mubr.msk.f32.mxu0 %vm819_vm1, %v820_v6  ;;  %749 = vmatprep.mubr.msk.f32.mxu1 %vm819_vm1, %v820_v6 }
  0x17   :  { %684 = vmatmul.mubr.msk.f32.gmra.mrb[6].mxu0 %vm68_vm4, %v17_v14  ;;  %750 = vmatmul.mubr.msk.f32.gmra.mrb[6].mxu1 %vm68_vm4, %v39_v15 }
  0x18   :  { %686 = vmatprep.mubr.msk.f32.mxu0 %vm819_vm1, %v820_v6  ;;  %752 = vmatprep.mubr.msk.f32.mxu1 %vm819_vm1, %v820_v6 }
  0x1b   :  { %687 = vmatmul.mubr.msk.f32.gmra.mrb[8].mxu0 %vm68_vm4, %v18_v16  ;;  %753 = vmatmul.mubr.msk.f32.gmra.mrb[8].mxu1 %vm68_vm4, %v40_v17 }
  0x1c   :  { %689 = vmatprep.mubr.msk.f32.mxu0 %vm819_vm1, %v820_v6  ;;  %755 = vmatprep.mubr.msk.f32.mxu1 %vm819_vm1, %v820_v6 }
  0x1f   :  { %690 = vmatmul.mubr.msk.f32.gmra.mrb[10].mxu0 %vm68_vm4, %v19_v18  ;;  %756 = vmatmul.mubr.msk.f32.gmra.mrb[10].mxu1 %vm68_vm4, %v41_v19 }
  0x20   :  { %692 = vmatprep.mubr.msk.f32.mxu0 %vm819_vm1, %v820_v6  ;;  %758 = vmatprep.mubr.msk.f32.mxu1 %vm819_vm1, %v820_v6 }
  0x23   :  { %693 = vmatmul.mubr.msk.f32.gmra.mrb[12].mxu0 %vm68_vm4, %v20_v20  ;;  %759 = vmatmul.mubr.msk.f32.gmra.mrb[12].mxu1 %vm68_vm4, %v42_v21 }
  0x24   :  { %695 = vmatprep.mubr.msk.f32.mxu0 %vm819_vm1, %v820_v6  ;;  %761 = vmatprep.mubr.msk.f32.mxu1 %vm819_vm1, %v820_v6 }
  0x27   :  { %696 = vmatmul.mubr.msk.f32.gmra.mrb[14].mxu0 %vm68_vm4, %v21_v22  ;;  %762 = vmatmul.mubr.msk.f32.gmra.mrb[14].mxu1 %vm68_vm4, %v43_v23 }
  0x28   :  { %698 = vmatprep.mubr.msk.f32.mxu0 %vm819_vm1, %v820_v6  ;;  %764 = vmatprep.mubr.msk.f32.mxu1 %vm819_vm1, %v820_v6 }
  0x2b   :  { %699 = vmatmul.mubr.msk.f32.gmra.mrb[16].mxu0 %vm68_vm4, %v22_v24  ;;  %765 = vmatmul.mubr.msk.f32.gmra.mrb[16].mxu1 %vm68_vm4, %v44_v25 }
  0x2c   :  { %701 = vmatprep.mubr.msk.f32.mxu0 %vm819_vm1, %v820_v6  ;;  %767 = vmatprep.mubr.msk.f32.mxu1 %vm819_vm1, %v820_v6 }
  0x2f   :  { %702 = vmatmul.mubr.msk.f32.gmra.mrb[18].mxu0 %vm68_vm4, %v23_v26  ;;  %768 = vmatmul.mubr.msk.f32.gmra.mrb[18].mxu1 %vm68_vm4, %v45_v27 }
  0x30   :  { %704 = vmatprep.mubr.msk.f32.mxu0 %vm819_vm1, %v820_v6  ;;  %770 = vmatprep.mubr.msk.f32.mxu1 %vm819_vm1, %v820_v6 }
  0x33   :  { %705 = vmatmul.mubr.msk.f32.gmra.mrb[20].mxu0 %vm68_vm4, %v24_v28  ;;  %771 = vmatmul.mubr.msk.f32.gmra.mrb[20].mxu1 %vm68_vm4, %v46_v29 }
  0x34   :  { %707 = vmatprep.mubr.msk.f32.mxu0 %vm819_vm1, %v820_v6  ;;  %773 = vmatprep.mubr.msk.f32.mxu1 %vm819_vm1, %v820_v6 }
  0x37   :  { %708 = vmatmul.mubr.msk.f32.gmra.mrb[22].mxu0 %vm68_vm4, %v25_v30  ;;  %774 = vmatmul.mubr.msk.f32.gmra.mrb[22].mxu1 %vm68_vm4, %v47_v31 }
  0x38   :  { %710 = vmatprep.mubr.msk.f32.mxu0 %vm819_vm1, %v820_v6  ;;  %776 = vmatprep.mubr.msk.f32.mxu1 %vm819_vm1, %v820_v6 }
  0x3b   :  { %711 = vmatmul.mubr.msk.f32.gmra.mrb[24].mxu0 %vm68_vm4, %v26_v32  ;;  %777 = vmatmul.mubr.msk.f32.gmra.mrb[24].mxu1 %vm68_vm4, %v48_v33 }
  0x3c   :  { %713 = vmatprep.mubr.msk.f32.mxu0 %vm819_vm1, %v820_v6  ;;  %779 = vmatprep.mubr.msk.f32.mxu1 %vm819_vm1, %v820_v6 }
  0x3f   :  { %714 = vmatmul.mubr.msk.f32.gmra.mrb[26].mxu0 %vm68_vm4, %v27_v34  ;;  %780 = vmatmul.mubr.msk.f32.gmra.mrb[26].mxu1 %vm68_vm4, %v49_v35 }
  0x40   :  { %716 = vmatprep.mubr.msk.f32.mxu0 %vm819_vm1, %v820_v6  ;;  %782 = vmatprep.mubr.msk.f32.mxu1 %vm819_vm1, %v820_v6 }
  0x43   :  { %717 = vmatmul.mubr.msk.f32.gmra.mrb[28].mxu0 %vm68_vm4, %v28_v36  ;;  %783 = vmatmul.mubr.msk.f32.gmra.mrb[28].mxu1 %vm68_vm4, %v50_v37 }
  0x44   :  { %719 = vmatprep.mubr.msk.f32.mxu0 %vm819_vm1, %v820_v6  ;;  %785 = vmatprep.mubr.msk.f32.mxu1 %vm819_vm1, %v820_v6 }
  0x47   :  { %720 = vmatmul.mubr.msk.f32.gmra.mrb[30].mxu0 %vm68_vm4, %v29_v38  ;;  %786 = vmatmul.mubr.msk.f32.gmra.mrb[30].mxu1 %vm68_vm4, %v51_v39 }
  0x48   :  { %722 = vmatprep.mubr.msk.f32.mxu0 %vm819_vm1, %v820_v6  ;;  %788 = vmatprep.mubr.msk.f32.mxu1 %vm819_vm1, %v820_v6 }
  0x4b   :  { %723 = vmatmul.mubr.msk.f32.gmra.mrb[32].mxu0 %vm68_vm4, %v30_v40  ;;  %789 = vmatmul.mubr.msk.f32.gmra.mrb[32].mxu1 %vm68_vm4, %v52_v41 }
  0x4c   :  { %725 = vmatprep.mubr.msk.f32.mxu0 %vm819_vm1, %v820_v6  ;;  %791 = vmatprep.mubr.msk.f32.mxu1 %vm819_vm1, %v820_v6 }
  0x4f   :  { %726 = vmatmul.mubr.msk.f32.gmra.mrb[34].mxu0 %vm68_vm4, %v31_v42  ;;  %792 = vmatmul.mubr.msk.f32.gmra.mrb[34].mxu1 %vm68_vm4, %v53_v43 }
  0x50   :  { %728 = vmatprep.mubr.msk.f32.mxu0 %vm819_vm1, %v820_v6  ;;  %794 = vmatprep.mubr.msk.f32.mxu1 %vm819_vm1, %v820_v6 }
  0x53   :  { %729 = vmatmul.mubr.msk.f32.gmra.mrb[36].mxu0 %vm68_vm4, %v32_v44  ;;  %795 = vmatmul.mubr.msk.f32.gmra.mrb[36].mxu1 %vm68_vm4, %v54_v45 }
  0x54   :  { %731 = vmatprep.mubr.msk.f32.mxu0 %vm819_vm1, %v820_v6  ;;  %797 = vmatprep.mubr.msk.f32.mxu1 %vm819_vm1, %v820_v6 }
  0x57   :  { %732 = vmatmul.mubr.msk.f32.gmra.mrb[38].mxu0 %vm68_vm4, %v33_v46  ;;  %798 = vmatmul.mubr.msk.f32.gmra.mrb[38].mxu1 %vm68_vm4, %v55_v47 }
  0x58   :  { %734 = vmatprep.mubr.msk.f32.mxu0 %vm819_vm1, %v820_v6  ;;  %800 = vmatprep.mubr.msk.f32.mxu1 %vm819_vm1, %v820_v6 }
  0x5b   :  { %735 = vmatmul.mubr.msk.f32.gmra.mrb[40].mxu0 %vm68_vm4, %v34_v48  ;;  %801 = vmatmul.mubr.msk.f32.gmra.mrb[40].mxu1 %vm68_vm4, %v56_v49 }
  0x5c   :  { %737 = vmatprep.mubr.msk.f32.mxu0 %vm819_vm1, %v820_v6 }
  0x5f   :  { %738 = vmatmul.mubr.msk.f32.gmra.mrb[42].mxu0 %vm68_vm4, %v35_v50 }
  0xde   :  { %v268_v52 = vpop.f32.mrb[0].mxu0  ;;  %v378_v53 = vpop.f32.mrb[0].mxu1 }
  0xdf   :  { %v269_v54 = vadd.f32 %v1115_v51, %v268_v52  ;;  %v676_v55 = vpop.f32.mrb[1].mxu0  ;;  %v379_v56 = vadd.f32 %v1115_v51, %v378_v53  ;;  %v742_v57 = vpop.f32.mrb[1].mxu1 }
  0xe1   :  { %v482_v58 = vmax.f32 %v269_v54, 0.0  ;;  %v504_v59 = vmax.f32 %v379_v56, 0.0 }
  0xe2   :  { %v273_v60 = vpop.f32.mrb[2].mxu0  ;;  %v383_v61 = vpop.f32.mrb[2].mxu1 }
  0xe3   :  { %526 = vst.msk [vmem:[%s1334_s3] sm:$0xff] %vm525_vm5, %v482_v58  ;;  %548 = vst.msk [vmem:[%s1334_s3 + $0xb0] sm:$0xff] %vm525_vm5, %v504_v59  ;;  %v274_v62 = vadd.f32 %v1115_v51, %v273_v60  ;;  %v679_v63 = vpop.f32.mrb[3].mxu0  ;;  %v384_v0 = vadd.f32 %v1115_v51, %v383_v61  ;;  %v745_v1 = vpop.f32.mrb[3].mxu1 }
  0xe5   :  { %v483_v2 = vmax.f32 %v274_v62, 0.0  ;;  %v505_v3 = vmax.f32 %v384_v0, 0.0 }
  0xe6   :  { %v278_v4 = vpop.f32.mrb[4].mxu0  ;;  %v388_v5 = vpop.f32.mrb[4].mxu1 }
  0xe7   :  { %527 = vst.msk [vmem:[%s1334_s3 + $0x8] sm:$0xff] %vm525_vm5, %v483_v2  ;;  %549 = vst.msk [vmem:[%s1334_s3 + $0xb8] sm:$0xff] %vm525_vm5, %v505_v3  ;;  %v279_v6 = vadd.f32 %v1115_v51, %v278_v4  ;;  %v682_v7 = vpop.f32.mrb[5].mxu0  ;;  %v389_v8 = vadd.f32 %v1115_v51, %v388_v5  ;;  %v748_v9 = vpop.f32.mrb[5].mxu1 }
  0xe9   :  { %v484_v10 = vmax.f32 %v279_v6, 0.0  ;;  %v506_v11 = vmax.f32 %v389_v8, 0.0 }
  0xea   :  { %v283_v12 = vpop.f32.mrb[6].mxu0  ;;  %v393_v13 = vpop.f32.mrb[6].mxu1 }
  0xeb   :  { %528 = vst.msk [vmem:[%s1334_s3 + $0x10] sm:$0xff] %vm525_vm5, %v484_v10  ;;  %550 = vst.msk [vmem:[%s1334_s3 + $0xc0] sm:$0xff] %vm525_vm5, %v506_v11  ;;  %v284_v14 = vadd.f32 %v1115_v51, %v283_v12  ;;  %v685_v15 = vpop.f32.mrb[7].mxu0  ;;  %v394_v16 = vadd.f32 %v1115_v51, %v393_v13  ;;  %v751_v17 = vpop.f32.mrb[7].mxu1 }
  0xed   :  { %v485_v18 = vmax.f32 %v284_v14, 0.0  ;;  %v507_v19 = vmax.f32 %v394_v16, 0.0 }
  0xee   :  { %v288_v20 = vpop.f32.mrb[8].mxu0  ;;  %v398_v21 = vpop.f32.mrb[8].mxu1 }
  0xef   :  { %529 = vst.msk [vmem:[%s1334_s3 + $0x18] sm:$0xff] %vm525_vm5, %v485_v18  ;;  %551 = vst.msk [vmem:[%s1334_s3 + $0xc8] sm:$0xff] %vm525_vm5, %v507_v19  ;;  %v289_v22 = vadd.f32 %v1115_v51, %v288_v20  ;;  %v688_v23 = vpop.f32.mrb[9].mxu0  ;;  %v399_v24 = vadd.f32 %v1115_v51, %v398_v21  ;;  %v754_v25 = vpop.f32.mrb[9].mxu1 }
  0xf1   :  { %v486_v26 = vmax.f32 %v289_v22, 0.0  ;;  %v508_v27 = vmax.f32 %v399_v24, 0.0 }
  0xf2   :  { %v293_v28 = vpop.f32.mrb[10].mxu0  ;;  %v403_v29 = vpop.f32.mrb[10].mxu1 }
  0xf3   :  { %530 = vst.msk [vmem:[%s1334_s3 + $0x20] sm:$0xff] %vm525_vm5, %v486_v26  ;;  %552 = vst.msk [vmem:[%s1334_s3 + $0xd0] sm:$0xff] %vm525_vm5, %v508_v27  ;;  %v294_v30 = vadd.f32 %v1115_v51, %v293_v28  ;;  %v691_v31 = vpop.f32.mrb[11].mxu0  ;;  %v404_v32 = vadd.f32 %v1115_v51, %v403_v29  ;;  %v757_v33 = vpop.f32.mrb[11].mxu1 }
  0xf5   :  { %v487_v34 = vmax.f32 %v294_v30, 0.0  ;;  %v509_v35 = vmax.f32 %v404_v32, 0.0 }
  0xf6   :  { %v298_v36 = vpop.f32.mrb[12].mxu0  ;;  %v408_v37 = vpop.f32.mrb[12].mxu1 }
  0xf7   :  { %531 = vst.msk [vmem:[%s1334_s3 + $0x28] sm:$0xff] %vm525_vm5, %v487_v34  ;;  %553 = vst.msk [vmem:[%s1334_s3 + $0xd8] sm:$0xff] %vm525_vm5, %v509_v35  ;;  %v299_v38 = vadd.f32 %v1115_v51, %v298_v36  ;;  %v694_v39 = vpop.f32.mrb[13].mxu0  ;;  %v409_v40 = vadd.f32 %v1115_v51, %v408_v37  ;;  %v760_v41 = vpop.f32.mrb[13].mxu1 }
  0xf9   :  { %v488_v42 = vmax.f32 %v299_v38, 0.0  ;;  %v510_v43 = vmax.f32 %v409_v40, 0.0 }
  0xfa   :  { %v303_v44 = vpop.f32.mrb[14].mxu0  ;;  %v413_v45 = vpop.f32.mrb[14].mxu1 }
  0xfb   :  { %532 = vst.msk [vmem:[%s1334_s3 + $0x30] sm:$0xff] %vm525_vm5, %v488_v42  ;;  %554 = vst.msk [vmem:[%s1334_s3 + $0xe0] sm:$0xff] %vm525_vm5, %v510_v43  ;;  %v304_v46 = vadd.f32 %v1115_v51, %v303_v44  ;;  %v697_v47 = vpop.f32.mrb[15].mxu0  ;;  %v414_v48 = vadd.f32 %v1115_v51, %v413_v45  ;;  %v763_v49 = vpop.f32.mrb[15].mxu1 }
  0xfd   :  { %v489_v50 = vmax.f32 %v304_v46, 0.0  ;;  %v511_v52 = vmax.f32 %v414_v48, 0.0 }
  0xfe   :  { %v308_v53 = vpop.f32.mrb[16].mxu0  ;;  %v418_v54 = vpop.f32.mrb[16].mxu1 }
  0xff   :  { %533 = vst.msk [vmem:[%s1334_s3 + $0x38] sm:$0xff] %vm525_vm5, %v489_v50  ;;  %555 = vst.msk [vmem:[%s1334_s3 + $0xe8] sm:$0xff] %vm525_vm5, %v511_v52  ;;  %v309_v55 = vadd.f32 %v1115_v51, %v308_v53  ;;  %v700_v56 = vpop.f32.mrb[17].mxu0  ;;  %v419_v57 = vadd.f32 %v1115_v51, %v418_v54  ;;  %v766_v58 = vpop.f32.mrb[17].mxu1 }
 0x101   :  { %v490_v59 = vmax.f32 %v309_v55, 0.0  ;;  %v512_v60 = vmax.f32 %v419_v57, 0.0 }
 0x102   :  { %v313_v61 = vpop.f32.mrb[18].mxu0  ;;  %v423_v62 = vpop.f32.mrb[18].mxu1 }
 0x103   :  { %534 = vst.msk [vmem:[%s1334_s3 + $0x40] sm:$0xff] %vm525_vm5, %v490_v59  ;;  %556 = vst.msk [vmem:[%s1334_s3 + $0xf0] sm:$0xff] %vm525_vm5, %v512_v60  ;;  %v314_v63 = vadd.f32 %v1115_v51, %v313_v61  ;;  %v703_v0 = vpop.f32.mrb[19].mxu0  ;;  %v424_v1 = vadd.f32 %v1115_v51, %v423_v62  ;;  %v769_v2 = vpop.f32.mrb[19].mxu1 }
 0x105   :  { %v491_v3 = vmax.f32 %v314_v63, 0.0  ;;  %v513_v4 = vmax.f32 %v424_v1, 0.0 }
 0x106   :  { %v318_v5 = vpop.f32.mrb[20].mxu0  ;;  %v428_v6 = vpop.f32.mrb[20].mxu1 }
 0x107   :  { %535 = vst.msk [vmem:[%s1334_s3 + $0x48] sm:$0xff] %vm525_vm5, %v491_v3  ;;  %557 = vst.msk [vmem:[%s1334_s3 + $0xf8] sm:$0xff] %vm525_vm5, %v513_v4  ;;  %v319_v7 = vadd.f32 %v1115_v51, %v318_v5  ;;  %v706_v8 = vpop.f32.mrb[21].mxu0  ;;  %v429_v9 = vadd.f32 %v1115_v51, %v428_v6  ;;  %v772_v10 = vpop.f32.mrb[21].mxu1 }
 0x109   :  { %v492_v11 = vmax.f32 %v319_v7, 0.0  ;;  %v514_v12 = vmax.f32 %v429_v9, 0.0 }
 0x10a   :  { %v323_v13 = vpop.f32.mrb[22].mxu0  ;;  %v433_v14 = vpop.f32.mrb[22].mxu1 }
 0x10b   :  { %536 = vst.msk [vmem:[%s1334_s3 + $0x50] sm:$0xff] %vm525_vm5, %v492_v11  ;;  %558 = vst.msk [vmem:[%s1334_s3 + $0x100] sm:$0xff] %vm525_vm5, %v514_v12  ;;  %v324_v15 = vadd.f32 %v1115_v51, %v323_v13  ;;  %v709_v16 = vpop.f32.mrb[23].mxu0  ;;  %v434_v17 = vadd.f32 %v1115_v51, %v433_v14  ;;  %v775_v18 = vpop.f32.mrb[23].mxu1 }
 0x10d   :  { %v493_v19 = vmax.f32 %v324_v15, 0.0  ;;  %v515_v20 = vmax.f32 %v434_v17, 0.0 }
 0x10e   :  { %v328_v21 = vpop.f32.mrb[24].mxu0  ;;  %v438_v22 = vpop.f32.mrb[24].mxu1 }
 0x10f   :  { %537 = vst.msk [vmem:[%s1334_s3 + $0x58] sm:$0xff] %vm525_vm5, %v493_v19  ;;  %559 = vst.msk [vmem:[%s1334_s3 + $0x108] sm:$0xff] %vm525_vm5, %v515_v20  ;;  %v329_v23 = vadd.f32 %v1115_v51, %v328_v21  ;;  %v712_v24 = vpop.f32.mrb[25].mxu0  ;;  %v439_v25 = vadd.f32 %v1115_v51, %v438_v22  ;;  %v778_v26 = vpop.f32.mrb[25].mxu1 }
 0x111   :  { %v494_v27 = vmax.f32 %v329_v23, 0.0  ;;  %v516_v28 = vmax.f32 %v439_v25, 0.0 }
 0x112   :  { %v333_v29 = vpop.f32.mrb[26].mxu0  ;;  %v443_v30 = vpop.f32.mrb[26].mxu1 }
 0x113   :  { %538 = vst.msk [vmem:[%s1334_s3 + $0x60] sm:$0xff] %vm525_vm5, %v494_v27  ;;  %560 = vst.msk [vmem:[%s1334_s3 + $0x110] sm:$0xff] %vm525_vm5, %v516_v28  ;;  %v334_v31 = vadd.f32 %v1115_v51, %v333_v29  ;;  %v715_v32 = vpop.f32.mrb[27].mxu0  ;;  %v444_v33 = vadd.f32 %v1115_v51, %v443_v30  ;;  %v781_v34 = vpop.f32.mrb[27].mxu1 }
 0x115   :  { %v495_v35 = vmax.f32 %v334_v31, 0.0  ;;  %v517_v36 = vmax.f32 %v444_v33, 0.0 }
 0x116   :  { %v338_v37 = vpop.f32.mrb[28].mxu0  ;;  %v448_v38 = vpop.f32.mrb[28].mxu1 }
 0x117   :  { %539 = vst.msk [vmem:[%s1334_s3 + $0x68] sm:$0xff] %vm525_vm5, %v495_v35  ;;  %561 = vst.msk [vmem:[%s1334_s3 + $0x118] sm:$0xff] %vm525_vm5, %v517_v36  ;;  %v339_v39 = vadd.f32 %v1115_v51, %v338_v37  ;;  %v718_v40 = vpop.f32.mrb[29].mxu0  ;;  %v449_v41 = vadd.f32 %v1115_v51, %v448_v38  ;;  %v784_v42 = vpop.f32.mrb[29].mxu1 }
 0x119   :  { %v496_v43 = vmax.f32 %v339_v39, 0.0  ;;  %v518_v44 = vmax.f32 %v449_v41, 0.0 }
 0x11a   :  { %v343_v45 = vpop.f32.mrb[30].mxu0  ;;  %v453_v46 = vpop.f32.mrb[30].mxu1 }
 0x11b   :  { %540 = vst.msk [vmem:[%s1334_s3 + $0x70] sm:$0xff] %vm525_vm5, %v496_v43  ;;  %562 = vst.msk [vmem:[%s1334_s3 + $0x120] sm:$0xff] %vm525_vm5, %v518_v44  ;;  %v344_v47 = vadd.f32 %v1115_v51, %v343_v45  ;;  %v721_v48 = vpop.f32.mrb[31].mxu0  ;;  %v454_v49 = vadd.f32 %v1115_v51, %v453_v46  ;;  %v787_v50 = vpop.f32.mrb[31].mxu1 }
 0x11d   :  { %v497_v52 = vmax.f32 %v344_v47, 0.0  ;;  %v519_v53 = vmax.f32 %v454_v49, 0.0 }
 0x11e   :  { %v348_v54 = vpop.f32.mrb[32].mxu0  ;;  %v458_v55 = vpop.f32.mrb[32].mxu1 }
 0x11f   :  { %541 = vst.msk [vmem:[%s1334_s3 + $0x78] sm:$0xff] %vm525_vm5, %v497_v52  ;;  %563 = vst.msk [vmem:[%s1334_s3 + $0x128] sm:$0xff] %vm525_vm5, %v519_v53  ;;  %v349_v56 = vadd.f32 %v1115_v51, %v348_v54  ;;  %v724_v57 = vpop.f32.mrb[33].mxu0  ;;  %v459_v58 = vadd.f32 %v1115_v51, %v458_v55  ;;  %v790_v59 = vpop.f32.mrb[33].mxu1 }
 0x121   :  { %v498_v60 = vmax.f32 %v349_v56, 0.0  ;;  %v520_v61 = vmax.f32 %v459_v58, 0.0 }
 0x122   :  { %v353_v62 = vpop.f32.mrb[34].mxu0  ;;  %v463_v63 = vpop.f32.mrb[34].mxu1 }
 0x123   :  { %542 = vst.msk [vmem:[%s1334_s3 + $0x80] sm:$0xff] %vm525_vm5, %v498_v60  ;;  %564 = vst.msk [vmem:[%s1334_s3 + $0x130] sm:$0xff] %vm525_vm5, %v520_v61  ;;  %v354_v0 = vadd.f32 %v1115_v51, %v353_v62  ;;  %v727_v1 = vpop.f32.mrb[35].mxu0  ;;  %v464_v2 = vadd.f32 %v1115_v51, %v463_v63  ;;  %v793_v3 = vpop.f32.mrb[35].mxu1 }
 0x125   :  { %v499_v4 = vmax.f32 %v354_v0, 0.0  ;;  %v521_v5 = vmax.f32 %v464_v2, 0.0 }
 0x126   :  { %v358_v6 = vpop.f32.mrb[36].mxu0  ;;  %v468_v7 = vpop.f32.mrb[36].mxu1 }
 0x127   :  { %543 = vst.msk [vmem:[%s1334_s3 + $0x88] sm:$0xff] %vm525_vm5, %v499_v4  ;;  %565 = vst.msk [vmem:[%s1334_s3 + $0x138] sm:$0xff] %vm525_vm5, %v521_v5  ;;  %v359_v8 = vadd.f32 %v1115_v51, %v358_v6  ;;  %v730_v9 = vpop.f32.mrb[37].mxu0  ;;  %v469_v10 = vadd.f32 %v1115_v51, %v468_v7  ;;  %v796_v11 = vpop.f32.mrb[37].mxu1 }
 0x129   :  { %v500_v12 = vmax.f32 %v359_v8, 0.0  ;;  %v522_v13 = vmax.f32 %v469_v10, 0.0 }
 0x12a   :  { %v363_v14 = vpop.f32.mrb[38].mxu0  ;;  %v473_v15 = vpop.f32.mrb[38].mxu1 }
 0x12b   :  { %544 = vst.msk [vmem:[%s1334_s3 + $0x90] sm:$0xff] %vm525_vm5, %v500_v12  ;;  %566 = vst.msk [vmem:[%s1334_s3 + $0x140] sm:$0xff] %vm525_vm5, %v522_v13  ;;  %v364_v16 = vadd.f32 %v1115_v51, %v363_v14  ;;  %v733_v17 = vpop.f32.mrb[39].mxu0  ;;  %v474_v18 = vadd.f32 %v1115_v51, %v473_v15  ;;  %v799_v19 = vpop.f32.mrb[39].mxu1 }
 0x12d   :  { %v501_v20 = vmax.f32 %v364_v16, 0.0  ;;  %v523_v21 = vmax.f32 %v474_v18, 0.0 }
 0x12e   :  { %v368_v22 = vpop.f32.mrb[40].mxu0  ;;  %v478_v23 = vpop.f32.mrb[40].mxu1 }
 0x12f   :  { %545 = vst.msk [vmem:[%s1334_s3 + $0x98] sm:$0xff] %vm525_vm5, %v501_v20  ;;  %567 = vst.msk [vmem:[%s1334_s3 + $0x148] sm:$0xff] %vm525_vm5, %v523_v21  ;;  %v369_v24 = vadd.f32 %v1115_v51, %v368_v22  ;;  %v736_v25 = vpop.f32.mrb[41].mxu0  ;;  %v479_v26 = vadd.f32 %v1115_v51, %v478_v23  ;;  %v802_v27 = vpop.f32.mrb[41].mxu1 }
 0x131   :  { %v502_v28 = vmax.f32 %v369_v24, 0.0  ;;  %v524_v29 = vmax.f32 %v479_v26, 0.0 }
 0x132   :  { %v373_v30 = vpop.f32.mrb[42].mxu0 }
 0x133   :  { %546 = vst.msk [vmem:[%s1334_s3 + $0xa0] sm:$0xff] %vm525_vm5, %v502_v28  ;;  %v374_v31 = vadd.f32 %v1115_v51, %v373_v30  ;;  %v739_v32 = vpop.f32.mrb[43].mxu0 }
 0x134   :  { %569 = vst.msk [vmem:[%s1334_s3 + $0x150] sm:$0x3] %vm568_vm6, %v524_v29 }
 0x135   :  { %v503_v33 = vmax.f32 %v374_v31, 0.0 }
 0x137   :  { %547 = vst.msk [vmem:[%s1334_s3 + $0xa8] sm:$0xff] %vm525_vm5, %v503_v33 }

// kernel: hybrid_q_forward.4
= control target key start
LH: loop header
LB: loop body
LE: loop exit
PB: predicated region body
PF: predicated region fallthrough
CT: control target
= control target key end

     0   :  { %v274_v0 = vmov 0.0|0.0   ;;  %vm57_vm0 = vcmask 130048   ;;  %vm204_vm1 = vcmask 261120   ;;  %s469_s1 = inlined_call_operand.vmem [shape: f32[144,32], index: 1, kind: input, shape index: {}]   ;;  %s470_s0 = inlined_call_operand.vmem [shape: f32[72,144], index: 0, kind: input, shape index: {}]   ;;  %s471_s2 = inlined_call_operand.vmem [shape: f32[1,32], index: 2, kind: input, shape index: {}]   ;;  %s472_s3 = inlined_call_operand.vmem [shape: f32[72,32], index: 3, kind: output, shape index: {}]  }
   0x1   :  { %228 = vmatprep.subr.bf16.mxu0 %v274_v0  ;;  %v32_v1 = vld [vmem:[%s469_s1] sm:$0xff]  ;;  %v33_v2 = vld [vmem:[%s469_s1 + $0x8] sm:$0xff]  ;;  %255 = vmatprep.subr.bf16.mxu1 %v274_v0  ;;  %v34_v3 = vld [vmem:[%s469_s1 + $0x10] sm:$0xff] }
   0x2   :  { %v229_v4 = vpack.c.bf16 %v33_v2, %v32_v1  ;;  %v35_v5 = vld [vmem:[%s469_s1 + $0x18] sm:$0xff]  ;;  %v36_v7 = vld [vmem:[%s469_s1 + $0x20] sm:$0xff]  ;;  %v37_v8 = vld [vmem:[%s469_s1 + $0x28] sm:$0xff] }
   0x3   :  { %v232_v6 = vpack.c.bf16 %v35_v5, %v34_v3  ;;  %v15_v9 = vld [vmem:[%s470_s0 + $0x8] sm:$0xff]  ;;  %v25_v10 = vld [vmem:[%s470_s0 + $0x58] sm:$0xff]  ;;  %v235_v11 = vpack.c.bf16 %v37_v8, %v36_v7  ;;  %v38_v12 = vld [vmem:[%s469_s1 + $0x30] sm:$0xff] }
   0x4   :  { %230 = vmatpush1.bf16.msra.mxu0 %v229_v4  ;;  %264 = vmatpush1.bf16.msra.mxu1 %v229_v4  ;;  %v39_v13 = vld [vmem:[%s469_s1 + $0x38] sm:$0xff]  ;;  %v40_v15 = vld [vmem:[%s469_s1 + $0x40] sm:$0xff]  ;;  %v41_v16 = vld [vmem:[%s469_s1 + $0x48] sm:$0xff] }
   0x5   :  { %231 = vmatprep.subr.bf16.mxu0 %v274_v0  ;;  %256 = vmatprep.subr.bf16.mxu1 %v274_v0  ;;  %v238_v14 = vpack.c.bf16 %v39_v13, %v38_v12  ;;  %v241_v17 = vpack.c.bf16 %v41_v16, %v40_v15  ;;  %v42_v18 = vld [vmem:[%s469_s1 + $0x50] sm:$0xff]  ;;  %v43_v19 = vld [vmem:[%s469_s1 + $0x58] sm:$0xff]  ;;  %v44_v21 = vld [vmem:[%s469_s1 + $0x60] sm:$0xff] }
   0x6   :  { %219 = vmatprep.mubr.msk.f32.mxu0 %vm57_vm0, %v15_v9  ;;  %224 = vmatprep.mubr.msk.f32.mxu1 %vm57_vm0, %v25_v10  ;;  %v244_v20 = vpack.c.bf16 %v43_v19, %v42_v18  ;;  %v45_v22 = vld [vmem:[%s469_s1 + $0x68] sm:$0xff]  ;;  %v46_v24 = vld [vmem:[%s469_s1 + $0x70] sm:$0xff]  ;;  %v47_v25 = vld [vmem:[%s469_s1 + $0x78] sm:$0xff] }
   0x7   :  { %v247_v23 = vpack.c.bf16 %v45_v22, %v44_v21  ;;  %v250_v26 = vpack.c.bf16 %v47_v25, %v46_v24  ;;  %v48_v27 = vld [vmem:[%s469_s1 + $0x80] sm:$0xff]  ;;  %v49_v28 = vld [vmem:[%s469_s1 + $0x88] sm:$0xff]  ;;  %v24_v31 = vld [vmem:[%s470_s0 + $0x50] sm:$0xff] }
   0x8   :  { %233 = vmatpush1.bf16.msra.mxu0 %v232_v6  ;;  %265 = vmatpush1.bf16.msra.mxu1 %v232_v6  ;;  %v253_v29 = vpack.c.bf16 %v49_v28, %v48_v27  ;;  %v14_v30 = vld [vmem:[%s470_s0] sm:$0xff]  ;;  %v17_v32 = vld [vmem:[%s470_s0 + $0x18] sm:$0xff]  ;;  %v27_v33 = vld [vmem:[%s470_s0 + $0x68] sm:$0xff] }
   0x9   :  { %234 = vmatprep.subr.bf16.mxu0 %v274_v0  ;;  %257 = vmatprep.subr.bf16.mxu1 %v274_v0  ;;  %v16_v34 = vld [vmem:[%s470_s0 + $0x10] sm:$0xff]  ;;  %v26_v35 = vld [vmem:[%s470_s0 + $0x60] sm:$0xff]  ;;  %v19_v36 = vld [vmem:[%s470_s0 + $0x28] sm:$0xff] }
   0xa   :  { %v29_v37 = vld [vmem:[%s470_s0 + $0x78] sm:$0xff]  ;;  %v18_v38 = vld [vmem:[%s470_s0 + $0x20] sm:$0xff]  ;;  %v28_v39 = vld [vmem:[%s470_s0 + $0x70] sm:$0xff] }
   0xb   :  { %v21_v40 = vld [vmem:[%s470_s0 + $0x38] sm:$0xff]  ;;  %v31_v41 = vld [vmem:[%s470_s0 + $0x88] sm:$0xff]  ;;  %v20_v42 = vld [vmem:[%s470_s0 + $0x30] sm:$0xff] }
   0xc   :  { %236 = vmatpush1.bf16.msra.mxu0 %v235_v11  ;;  %266 = vmatpush1.bf16.msra.mxu1 %v235_v11  ;;  %v30_v43 = vld [vmem:[%s470_s0 + $0x80] sm:$0xff]  ;;  %v23_v44 = vld [vmem:[%s470_s0 + $0x48] sm:$0xff] }
   0xd   :  { %237 = vmatprep.subr.bf16.mxu0 %v274_v0  ;;  %258 = vmatprep.subr.bf16.mxu1 %v274_v0  ;;  %v22_v45 = vld [vmem:[%s470_s0 + $0x40] sm:$0xff] }
   0xe   :  { %v218_v46 = vld [vmem:[%s471_s2] ss:$0 sm:$0xff] }
  0x10   :  { %239 = vmatpush1.bf16.msra.mxu0 %v238_v14  ;;  %267 = vmatpush1.bf16.msra.mxu1 %v238_v14 }
  0x11   :  { %240 = vmatprep.subr.bf16.mxu0 %v274_v0  ;;  %259 = vmatprep.subr.bf16.mxu1 %v274_v0 }
  0x14   :  { %242 = vmatpush1.bf16.msra.mxu0 %v241_v17  ;;  %268 = vmatpush1.bf16.msra.mxu1 %v241_v17 }
  0x15   :  { %243 = vmatprep.subr.bf16.mxu0 %v274_v0  ;;  %260 = vmatprep.subr.bf16.mxu1 %v274_v0 }
  0x18   :  { %245 = vmatpush1.bf16.msra.mxu0 %v244_v20  ;;  %269 = vmatpush1.bf16.msra.mxu1 %v244_v20 }
  0x19   :  { %246 = vmatprep.subr.bf16.mxu0 %v274_v0  ;;  %261 = vmatprep.subr.bf16.mxu1 %v274_v0 }
  0x1c   :  { %248 = vmatpush1.bf16.msra.mxu0 %v247_v23  ;;  %270 = vmatpush1.bf16.msra.mxu1 %v247_v23 }
  0x1d   :  { %249 = vmatprep.subr.bf16.mxu0 %v274_v0  ;;  %262 = vmatprep.subr.bf16.mxu1 %v274_v0 }
  0x20   :  { %251 = vmatpush1.bf16.msra.mxu0 %v250_v26  ;;  %271 = vmatpush1.bf16.msra.mxu1 %v250_v26 }
  0x21   :  { %252 = vmatprep.subr.bf16.mxu0 %v274_v0  ;;  %263 = vmatprep.subr.bf16.mxu1 %v274_v0 }
  0x24   :  { %254 = vmatpush1.bf16.msra.mxu0 %v253_v29  ;;  %272 = vmatpush1.bf16.msra.mxu1 %v253_v29 }
  0x27   :  { %150 = vmatmul.mubr.f32.vlgmr.msra.gmra.mrb[0].mxu0 %v14_v30  ;;  %175 = vmatmul.mubr.f32.vlgmr.msra.gmra.mrb[0].mxu1 %v24_v31 }
  0x28   :  { %220 = vmatprep.mubr.msk.f32.mxu0 %vm57_vm0, %v17_v32  ;;  %225 = vmatprep.mubr.msk.f32.mxu1 %vm57_vm0, %v27_v33 }
  0x2b   :  { %155 = vmatmul.mubr.f32.gmra.mrb[2].mxu0 %v16_v34  ;;  %180 = vmatmul.mubr.f32.gmra.mrb[2].mxu1 %v26_v35 }
  0x2c   :  { %221 = vmatprep.mubr.msk.f32.mxu0 %vm57_vm0, %v19_v36  ;;  %226 = vmatprep.mubr.msk.f32.mxu1 %vm57_vm0, %v29_v37 }
  0x2f   :  { %160 = vmatmul.mubr.f32.gmra.mrb[4].mxu0 %v18_v38  ;;  %185 = vmatmul.mubr.f32.gmra.mrb[4].mxu1 %v28_v39 }
  0x30   :  { %222 = vmatprep.mubr.msk.f32.mxu0 %vm57_vm0, %v21_v40  ;;  %227 = vmatprep.mubr.msk.f32.mxu1 %vm57_vm0, %v31_v41 }
  0x33   :  { %165 = vmatmul.mubr.f32.gmra.mrb[6].mxu0 %v20_v42  ;;  %190 = vmatmul.mubr.f32.gmra.mrb[6].mxu1 %v30_v43 }
  0x34   :  { %223 = vmatprep.mubr.msk.f32.mxu0 %vm57_vm0, %v23_v44 }
  0x37   :  { %170 = vmatmul.mubr.f32.gmra.mrb[8].mxu0 %v22_v45 }
  0xfa   :  { %v151_v47 = vpop.f32.mrb[0].mxu0  ;;  %v176_v48 = vpop.f32.mrb[0].mxu1 }
  0xfb   :  { %v152_v49 = vadd.f32 %v218_v46, %v151_v47  ;;  %v153_v50 = vpop.f32.mrb[1].mxu0  ;;  %v177_v51 = vadd.f32 %v218_v46, %v176_v48  ;;  %v178_v52 = vpop.f32.mrb[1].mxu1 }
  0xfd   :  { %v195_v53 = vmax.f32 %v152_v49, 0.0  ;;  %v200_v54 = vmax.f32 %v177_v51, 0.0 }
  0xfe   :  { %v156_v55 = vpop.f32.mrb[2].mxu0  ;;  %v181_v56 = vpop.f32.mrb[2].mxu1 }
  0xff   :  { %205 = vst.msk [vmem:[%s472_s3] sm:$0xff] %vm204_vm1, %v195_v53  ;;  %210 = vst.msk [vmem:[%s472_s3 + $0x28] sm:$0xff] %vm204_vm1, %v200_v54  ;;  %v157_v57 = vadd.f32 %v218_v46, %v156_v55  ;;  %v158_v58 = vpop.f32.mrb[3].mxu0  ;;  %v182_v59 = vadd.f32 %v218_v46, %v181_v56  ;;  %v183_v60 = vpop.f32.mrb[3].mxu1 }
 0x101   :  { %v196_v61 = vmax.f32 %v157_v57, 0.0  ;;  %v201_v62 = vmax.f32 %v182_v59, 0.0 }
 0x102   :  { %v161_v63 = vpop.f32.mrb[4].mxu0  ;;  %v186_v0 = vpop.f32.mrb[4].mxu1 }
 0x103   :  { %206 = vst.msk [vmem:[%s472_s3 + $0x8] sm:$0xff] %vm204_vm1, %v196_v61  ;;  %211 = vst.msk [vmem:[%s472_s3 + $0x30] sm:$0xff] %vm204_vm1, %v201_v62  ;;  %v162_v1 = vadd.f32 %v218_v46, %v161_v63  ;;  %v163_v2 = vpop.f32.mrb[5].mxu0  ;;  %v187_v3 = vadd.f32 %v218_v46, %v186_v0  ;;  %v188_v4 = vpop.f32.mrb[5].mxu1 }
 0x105   :  { %v197_v5 = vmax.f32 %v162_v1, 0.0  ;;  %v202_v6 = vmax.f32 %v187_v3, 0.0 }
 0x106   :  { %v166_v7 = vpop.f32.mrb[6].mxu0  ;;  %v191_v8 = vpop.f32.mrb[6].mxu1 }
 0x107   :  { %207 = vst.msk [vmem:[%s472_s3 + $0x10] sm:$0xff] %vm204_vm1, %v197_v5  ;;  %212 = vst.msk [vmem:[%s472_s3 + $0x38] sm:$0xff] %vm204_vm1, %v202_v6  ;;  %v167_v9 = vadd.f32 %v218_v46, %v166_v7  ;;  %v168_v10 = vpop.f32.mrb[7].mxu0  ;;  %v192_v11 = vadd.f32 %v218_v46, %v191_v8  ;;  %v193_v12 = vpop.f32.mrb[7].mxu1 }
 0x109   :  { %v198_v13 = vmax.f32 %v167_v9, 0.0  ;;  %v203_v14 = vmax.f32 %v192_v11, 0.0 }
 0x10a   :  { %v171_v15 = vpop.f32.mrb[8].mxu0 }
 0x10b   :  { %208 = vst.msk [vmem:[%s472_s3 + $0x18] sm:$0xff] %vm204_vm1, %v198_v13  ;;  %213 = vst.msk [vmem:[%s472_s3 + $0x40] sm:$0xff] %vm204_vm1, %v203_v14  ;;  %v172_v16 = vadd.f32 %v218_v46, %v171_v15  ;;  %v173_v17 = vpop.f32.mrb[9].mxu0 }
 0x10d   :  { %v199_v18 = vmax.f32 %v172_v16, 0.0 }
 0x10f   :  { %209 = vst.msk [vmem:[%s472_s3 + $0x20] sm:$0xff] %vm204_vm1, %v199_v18 }

// kernel: hybrid_q_forward.5
= control target key start
LH: loop header
LB: loop body
LE: loop exit
PB: predicated region body
PF: predicated region fallthrough
CT: control target
= control target key end

     0   :  { %v1131_v3 = vmov 0.0   ;;  %vm251_vm0 = vcmask 1043456   ;;  %vm247_vm1 = vcmask 31744   ;;  %v1132_v63 = vmov 0.0|0.0   ;;  %s1641_s1 = inlined_call_operand.vmem [shape: f32[288,64], index: 1, kind: input, shape index: {}]   ;;  %s1642_s0 = inlined_call_operand.vmem [shape: f32[8,288], index: 0, kind: input, shape index: {}]   ;;  %s1643_s5 = inlined_call_operand.vmem [shape: f32[4,256], index: 5, kind: input, shape index: {}]   ;;  %s1644_s4 = inlined_call_operand.vmem [shape: f32[4,64,256], index: 4, kind: input, shape index: {}]   ;;  %s1645_s3 = inlined_call_operand.vmem [shape: f32[2,4], index: 3, kind: input, shape index: {}]   ;;  %s1646_s7 = inlined_call_operand.vmem [shape: f32[256,128], index: 7, kind: input, shape index: {}]   ;;  %s1647_s2 = inlined_call_operand.vmem [shape: f32[1,64], index: 2, kind: input, shape index: {}]   ;;  %s1648_s6 = inlined_call_operand.vmem [shape: f32[1,256], index: 6, kind: input, shape index: {}]   ;;  %s1649_s10 = inlined_call_operand.<no memory space> [shape: f32[1,1], index: 10, kind: input, shape index: {}]   ;;  %s1650_s8 = inlined_call_operand.vmem [shape: f32[1,128], index: 8, kind: input, shape index: {}]   ;;  %s1651_s9 = inlined_call_operand.vmem [shape: f32[1,128], index: 9, kind: input, shape index: {}]   ;;  %s1652_s11 = inlined_call_operand.vmem [shape: f32[2,1], index: 11, kind: output, shape index: {}]  }
   0x1   :  { %v59_v0 = vld [vmem:[%s1641_s1 + $0x80] sm:$0xff]  ;;  %v60_v1 = vld [vmem:[%s1641_s1 + $0x88] sm:$0xff]  ;;  %320 = vmatprep.mubr.f32.mxu1 %v1131_v3  ;;  %v61_v6 = vld [vmem:[%s1641_s1 + $0x90] sm:$0xff]  ;;  %vm1133_vm2 = vmmov 0   ;;  %vm86_vm3 = vcmask 261120   ;;  %vm343_vm4 = vcmask 523264  }
   0x2   :  { %v43_v2 = vld [vmem:[%s1641_s1] sm:$0xff]  ;;  %v983_v4 = vpack.c.bf16 %v60_v1, %v59_v0  ;;  %v44_v5 = vld [vmem:[%s1641_s1 + $0x8] sm:$0xff]  ;;  %v62_v7 = vld [vmem:[%s1641_s1 + $0x98] sm:$0xff]  ;;  %vm819_vm5 = vcmask 1041408   ;;  %vm831_vm6 = vcmask 1024  }
   0x3   :  { %v985_v8 = vpack.c.bf16 %v44_v5, %v43_v2  ;;  %v987_v9 = vpack.c.bf16 %v62_v7, %v61_v6  ;;  %v45_v10 = vld [vmem:[%s1641_s1 + $0x10] sm:$0xff]  ;;  %v46_v11 = vld [vmem:[%s1641_s1 + $0x18] sm:$0xff]  ;;  %v63_v12 = vld [vmem:[%s1641_s1 + $0xa0] sm:$0xff] }
   0x4   :  { %984 = vmatprep.subr.bf16.mxu0 %v983_v4  ;;  %v64_v13 = vld [vmem:[%s1641_s1 + $0xa8] sm:$0xff]  ;;  %v989_v14 = vpack.c.bf16 %v46_v11, %v45_v10  ;;  %v47_v16 = vld [vmem:[%s1641_s1 + $0x20] sm:$0xff]  ;;  %v65_v18 = vld [vmem:[%s1641_s1 + $0xb0] sm:$0xff] }
   0x5   :  { %986 = vmatpush3.bf16.msra.mxu0 %v985_v8  ;;  %v991_v15 = vpack.c.bf16 %v64_v13, %v63_v12  ;;  %v48_v17 = vld [vmem:[%s1641_s1 + $0x28] sm:$0xff]  ;;  %v66_v19 = vld [vmem:[%s1641_s1 + $0xb8] sm:$0xff]  ;;  %v49_v22 = vld [vmem:[%s1641_s1 + $0x30] sm:$0xff] }
   0x6   :  { %988 = vmatprep.subr.bf16.mxu0 %v987_v9  ;;  %v993_v20 = vpack.c.bf16 %v48_v17, %v47_v16  ;;  %v995_v21 = vpack.c.bf16 %v66_v19, %v65_v18  ;;  %v50_v23 = vld [vmem:[%s1641_s1 + $0x38] sm:$0xff]  ;;  %v67_v24 = vld [vmem:[%s1641_s1 + $0xc0] sm:$0xff]  ;;  %v68_v25 = vld [vmem:[%s1641_s1 + $0xc8] sm:$0xff] }
   0x7   :  { %v41_v26 = vld [vmem:[%s1642_s0 + $0x8] sm:$0xff]  ;;  %v997_v27 = vpack.c.bf16 %v50_v23, %v49_v22  ;;  %v51_v28 = vld [vmem:[%s1641_s1 + $0x40] sm:$0xff]  ;;  %v69_v30 = vld [vmem:[%s1641_s1 + $0xd0] sm:$0xff]  ;;  %v999_v31 = vpack.c.bf16 %v68_v25, %v67_v24 }
   0x8   :  { %154 = vmatprep.mubr.f32.mxu0 %v41_v26  ;;  %v52_v29 = vld [vmem:[%s1641_s1 + $0x48] sm:$0xff]  ;;  %v232_v32 = vld [vmem:[%s1643_s5] sm:$0xff]  ;;  %v330_v34 = vld [vmem:[%s1644_s4 + $0x18] sm:$0xff] }
   0x9   :  { %990 = vmatpush3.bf16.msra.mxu0 %v989_v14  ;;  %v328_v33 = vld [vmem:[%s1644_s4 + $0x8] sm:$0xff]  ;;  %v70_v35 = vld [vmem:[%s1641_s1 + $0xd8] sm:$0xff]  ;;  %v246_v36 = vcombine.high %v232_v32, %v232_v32  ;;  %v327_v38 = vld [vmem:[%s1644_s4] sm:$0xff]  ;;  %v1001_v42 = vpack.c.bf16 %v52_v29, %v51_v28 }
   0xa   :  { %992 = vmatprep.subr.bf16.mxu0 %v991_v15  ;;  %v1021_v37 = vpack.c.bf16 %v330_v34, %v328_v33  ;;  %v329_v39 = vld [vmem:[%s1644_s4 + $0x10] sm:$0xff]  ;;  %v231_v40 = vld [vmem:[%s1645_s3] sm:$0x3]  ;;  %v1003_v43 = vpack.c.bf16 %v70_v35, %v69_v30  ;;  %v54_v45 = vld [vmem:[%s1641_s1 + $0x58] sm:$0xff] }
   0xb   :  { %v1023_v41 = vpack.c.bf16 %v329_v39, %v327_v38  ;;  %839 = vmatprep.subr.msk.mxu1 %vm251_vm0, %v246_v36  ;;  %v53_v44 = vld [vmem:[%s1641_s1 + $0x50] sm:$0xff]  ;;  %v71_v46 = vld [vmem:[%s1641_s1 + $0xe0] sm:$0xff]  ;;  %v72_v47 = vld [vmem:[%s1641_s1 + $0xe8] sm:$0xff] }
   0xc   :  { %840 = vmatpush1.msk.msra.mxu1 %vm251_vm0, %v232_v32  ;;  %v1005_v48 = vpack.c.bf16 %v54_v45, %v53_v44  ;;  %v1007_v49 = vpack.c.bf16 %v72_v47, %v71_v46  ;;  %v55_v50 = vld [vmem:[%s1641_s1 + $0x60] sm:$0xff]  ;;  %v56_v51 = vld [vmem:[%s1641_s1 + $0x68] sm:$0xff]  ;;  %v73_v52 = vld [vmem:[%s1641_s1 + $0xf0] sm:$0xff] }
   0xd   :  { %994 = vmatpush3.bf16.msra.mxu0 %v993_v20  ;;  %1022 = vmatprep.subr.bf16.mxu1 %v1021_v37  ;;  %v74_v53 = vld [vmem:[%s1641_s1 + $0xf8] sm:$0xff]  ;;  %v1009_v54 = vpack.c.bf16 %v56_v51, %v55_v50  ;;  %v57_v56 = vld [vmem:[%s1641_s1 + $0x70] sm:$0xff]  ;;  %v75_v59 = vld [vmem:[%s1641_s1 + $0x100] sm:$0xff] }
   0xe   :  { %996 = vmatprep.subr.bf16.mxu0 %v995_v21  ;;  %841 = vmatmul.mubr.msk.f32.vlgmr.msra.gmra.mrb[0].mxu1 %vm247_vm1, %v231_v40  ;;  %v1011_v55 = vpack.c.bf16 %v74_v53, %v73_v52  ;;  %v58_v57 = vld [vmem:[%s1641_s1 + $0x78] sm:$0xff]  ;;  %v76_v60 = vld [vmem:[%s1641_s1 + $0x108] sm:$0xff]  ;;  %v40_v61 = vld [vmem:[%s1642_s0] sm:$0xff] }
   0xf   :  { %1024 = vmatpush1.bf16.msra.mxu1 %v1023_v41  ;;  %411 = vmatprep.mubr.f32.mxu1 %v1131_v3  ;;  %v1013_v58 = vpack.c.bf16 %v58_v57, %v57_v56  ;;  %v1016_v62 = vpack.c.bf16 %v76_v60, %v75_v59  ;;  %v77_v0 = vld [vmem:[%s1641_s1 + $0x110] sm:$0xff]  ;;  %v78_v1 = vld [vmem:[%s1641_s1 + $0x118] sm:$0xff]  ;;  %v332_v5 = vld [vmem:[%s1644_s4 + $0x28] sm:$0xff] }
  0x10   :  { %v1019_v2 = vpack.c.bf16 %v78_v1, %v77_v0  ;;  %v42_v4 = vld [vmem:[%s1642_s0 + $0x10] sm:$0xff]  ;;  %v334_v6 = vld [vmem:[%s1644_s4 + $0x38] sm:$0xff]  ;;  %v331_v8 = vld [vmem:[%s1644_s4 + $0x20] sm:$0xff] }
  0x11   :  { %998 = vmatpush3.bf16.msra.mxu0 %v997_v27  ;;  %v1025_v7 = vpack.c.bf16 %v334_v6, %v332_v5  ;;  %v333_v9 = vld [vmem:[%s1644_s4 + $0x30] sm:$0xff]  ;;  %v336_v11 = vld [vmem:[%s1644_s4 + $0x48] sm:$0xff]  ;;  %v338_v12 = vld [vmem:[%s1644_s4 + $0x58] sm:$0xff] }
  0x12   :  { %1000 = vmatprep.subr.bf16.mxu0 %v999_v31  ;;  %v1027_v10 = vpack.c.bf16 %v333_v9, %v331_v8  ;;  %v1029_v13 = vpack.c.bf16 %v338_v12, %v336_v11  ;;  %v335_v14 = vld [vmem:[%s1644_s4 + $0x40] sm:$0xff]  ;;  %v337_v15 = vld [vmem:[%s1644_s4 + $0x50] sm:$0xff]  ;;  %v340_v17 = vld [vmem:[%s1644_s4 + $0x68] sm:$0xff] }
  0x13   :  { %1026 = vmatprep.subr.bf16.mxu1 %v1025_v7  ;;  %v1031_v16 = vpack.c.bf16 %v337_v15, %v335_v14  ;;  %v342_v18 = vld [vmem:[%s1644_s4 + $0x78] sm:$0xff]  ;;  %v339_v20 = vld [vmem:[%s1644_s4 + $0x60] sm:$0xff]  ;;  %v341_v21 = vld [vmem:[%s1644_s4 + $0x70] sm:$0xff] }
  0x14   :  { %1028 = vmatpush1.bf16.msra.mxu1 %v1027_v10  ;;  %v1033_v19 = vpack.c.bf16 %v342_v18, %v340_v17  ;;  %v1035_v22 = vpack.c.bf16 %v341_v21, %v339_v20  ;;  %v844_v23 = vld [vmem:[%s1644_s4 + $0x88] sm:$0xff]  ;;  %v846_v24 = vld [vmem:[%s1644_s4 + $0x98] sm:$0xff]  ;;  %v717_v26 = vld [vmem:[%s1646_s7 + $0x80] sm:$0xff] }
  0x15   :  { %1002 = vmatpush3.bf16.msra.mxu0 %v1001_v42  ;;  %1030 = vmatprep.subr.bf16.mxu1 %v1029_v13  ;;  %v1037_v25 = vpack.c.bf16 %v846_v24, %v844_v23  ;;  %v718_v27 = vld [vmem:[%s1646_s7 + $0x88] sm:$0xff]  ;;  %v701_v28 = vld [vmem:[%s1646_s7] sm:$0xff]  ;;  %v719_v31 = vld [vmem:[%s1646_s7 + $0x90] sm:$0xff] }
  0x16   :  { %1004 = vmatprep.subr.bf16.mxu0 %v1003_v43  ;;  %v1085_v29 = vpack.c.bf16 %v718_v27, %v717_v26  ;;  %v702_v30 = vld [vmem:[%s1646_s7 + $0x8] sm:$0xff]  ;;  %v720_v32 = vld [vmem:[%s1646_s7 + $0x98] sm:$0xff]  ;;  %v703_v35 = vld [vmem:[%s1646_s7 + $0x10] sm:$0xff] }
  0x17   :  { %v1087_v33 = vpack.c.bf16 %v702_v30, %v701_v28  ;;  %v1089_v34 = vpack.c.bf16 %v720_v32, %v719_v31  ;;  %v704_v36 = vld [vmem:[%s1646_s7 + $0x18] sm:$0xff]  ;;  %v721_v37 = vld [vmem:[%s1646_s7 + $0xa0] sm:$0xff]  ;;  %v722_v38 = vld [vmem:[%s1646_s7 + $0xa8] sm:$0xff] }
  0x18   :  { %1032 = vmatpush1.bf16.msra.mxu1 %v1031_v16  ;;  %v1091_v39 = vpack.c.bf16 %v704_v36, %v703_v35  ;;  %v1093_v40 = vpack.c.bf16 %v722_v38, %v721_v37  ;;  %v705_v41 = vld [vmem:[%s1646_s7 + $0x20] sm:$0xff]  ;;  %v706_v42 = vld [vmem:[%s1646_s7 + $0x28] sm:$0xff]  ;;  %v723_v43 = vld [vmem:[%s1646_s7 + $0xb0] sm:$0xff] }
  0x19   :  { %1006 = vmatpush3.bf16.msra.mxu0 %v1005_v48  ;;  %1034 = vmatprep.subr.bf16.mxu1 %v1033_v19  ;;  %v724_v44 = vld [vmem:[%s1646_s7 + $0xb8] sm:$0xff]  ;;  %v1095_v45 = vpack.c.bf16 %v706_v42, %v705_v41  ;;  %v707_v47 = vld [vmem:[%s1646_s7 + $0x30] sm:$0xff]  ;;  %v726_v50 = vld [vmem:[%s1646_s7 + $0xc8] sm:$0xff] }
  0x1a   :  { %1008 = vmatprep.subr.bf16.mxu0 %v1007_v49  ;;  %v1097_v46 = vpack.c.bf16 %v724_v44, %v723_v43  ;;  %v708_v48 = vld [vmem:[%s1646_s7 + $0x38] sm:$0xff]  ;;  %v725_v49 = vld [vmem:[%s1646_s7 + $0xc0] sm:$0xff]  ;;  %v711_v59 = vld [vmem:[%s1646_s7 + $0x50] sm:$0xff] }
  0x1b   :  { %v1099_v51 = vpack.c.bf16 %v708_v48, %v707_v47  ;;  %v1101_v52 = vpack.c.bf16 %v726_v50, %v725_v49  ;;  %v709_v53 = vld [vmem:[%s1646_s7 + $0x40] sm:$0xff]  ;;  %v728_v56 = vld [vmem:[%s1646_s7 + $0xd8] sm:$0xff]  ;;  %v845_v8 = vld [vmem:[%s1644_s4 + $0x90] sm:$0xff] }
  0x1c   :  { %1036 = vmatpush1.bf16.msra.mxu1 %v1035_v22  ;;  %v712_v60 = vld [vmem:[%s1646_s7 + $0x58] sm:$0xff]  ;;  %v837_v5 = vld [vmem:[%s1647_s2] ss:$0 sm:$0xff]  ;;  %v848_v10 = vld [vmem:[%s1644_s4 + $0xa8] sm:$0xff] }
  0x1d   :  { %1010 = vmatpush3.bf16.msra.mxu0 %v1009_v54  ;;  %1038 = vmatprep.subr.bf16.mxu1 %v1037_v25  ;;  %v710_v54 = vld [vmem:[%s1646_s7 + $0x48] sm:$0xff]  ;;  %v843_v7 = vld [vmem:[%s1644_s4 + $0x80] sm:$0xff]  ;;  %v850_v11 = vld [vmem:[%s1644_s4 + $0xb8] sm:$0xff] }
  0x1e   :  { %1012 = vmatprep.subr.bf16.mxu0 %v1011_v55  ;;  %v727_v55 = vld [vmem:[%s1646_s7 + $0xd0] sm:$0xff]  ;;  %v1103_v57 = vpack.c.bf16 %v710_v54, %v709_v53  ;;  %v1039_v14 = vpack.c.bf16 %v845_v8, %v843_v7  ;;  %v1041_v16 = vpack.c.bf16 %v850_v11, %v848_v10  ;;  %v847_v17 = vld [vmem:[%s1644_s4 + $0xa0] sm:$0xff]  ;;  %v852_v19 = vld [vmem:[%s1644_s4 + $0xc8] sm:$0xff] }
  0x1f   :  { %v849_v18 = vld [vmem:[%s1644_s4 + $0xb0] sm:$0xff]  ;;  %v854_v20 = vld [vmem:[%s1644_s4 + $0xd8] sm:$0xff]  ;;  %v851_v23 = vld [vmem:[%s1644_s4 + $0xc0] sm:$0xff] }
  0x20   :  { %v1043_v21 = vpack.c.bf16 %v849_v18, %v847_v17  ;;  %v1045_v22 = vpack.c.bf16 %v854_v20, %v852_v19  ;;  %v853_v24 = vld [vmem:[%s1644_s4 + $0xd0] sm:$0xff]  ;;  %v856_v25 = vld [vmem:[%s1644_s4 + $0xe8] sm:$0xff]  ;;  %v858_v26 = vld [vmem:[%s1644_s4 + $0xf8] sm:$0xff] }
  0x21   :  { %1014 = vmatpush3.bf16.msra.mxu0 %v1013_v58  ;;  %v1105_v58 = vpack.c.bf16 %v728_v56, %v727_v55  ;;  %v1047_v27 = vpack.c.bf16 %v853_v24, %v851_v23  ;;  %v1049_v28 = vpack.c.bf16 %v858_v26, %v856_v25  ;;  %v857_v30 = vld [vmem:[%s1644_s4 + $0xf0] sm:$0xff]  ;;  %v861_v31 = vld [vmem:[%s1644_s4 + $0x108] sm:$0xff]  ;;  %v863_v32 = vld [vmem:[%s1644_s4 + $0x118] sm:$0xff] }
  0x22   :  { %1015 = vmatprep.subr.bf16.mxu0 %v1132_v63  ;;  %v860_v35 = vld [vmem:[%s1644_s4 + $0x100] sm:$0xff]  ;;  %v862_v36 = vld [vmem:[%s1644_s4 + $0x110] sm:$0xff]  ;;  %v865_v37 = vld [vmem:[%s1644_s4 + $0x128] sm:$0xff] }
  0x23   :  { %v867_v38 = vld [vmem:[%s1644_s4 + $0x138] sm:$0xff]  ;;  %v864_v42 = vld [vmem:[%s1644_s4 + $0x120] sm:$0xff]  ;;  %v866_v43 = vld [vmem:[%s1644_s4 + $0x130] sm:$0xff] }
  0x24   :  { %155 = vmatmul.mubr.f32.vlgmr.msra.gmra.mrb[0].mxu0 %v40_v61  ;;  %v729_v61 = vld [vmem:[%s1646_s7 + $0xe0] sm:$0xff]  ;;  %v1057_v41 = vpack.c.bf16 %v867_v38, %v865_v37  ;;  %v869_v44 = vld [vmem:[%s1644_s4 + $0x148] sm:$0xff]  ;;  %v870_v49 = vld [vmem:[%s1644_s4 + $0x150] sm:$0xff] }
  0x25   :  { %1017 = vmatpush3.bf16.msra.mxu0 %v1016_v62  ;;  %980 = vmatprep.mubr.msk.f32.mxu0 %vm1133_vm2, %v1131_v3  ;;  %v730_v62 = vld [vmem:[%s1646_s7 + $0xe8] sm:$0xff]  ;;  %v868_v48 = vld [vmem:[%s1644_s4 + $0x140] sm:$0xff]  ;;  %v874_v55 = vld [vmem:[%s1644_s4 + $0x170] sm:$0xff] }
  0x26   :  { %1018 = vmatprep.subr.bf16.mxu0 %v1132_v63  ;;  %v1107_v63 = vpack.c.bf16 %v712_v60, %v711_v59  ;;  %v1109_v0 = vpack.c.bf16 %v730_v62, %v729_v61  ;;  %v873_v50 = vld [vmem:[%s1644_s4 + $0x168] sm:$0xff]  ;;  %v872_v54 = vld [vmem:[%s1644_s4 + $0x160] sm:$0xff]  ;;  %v879_v61 = vld [vmem:[%s1644_s4 + $0x190] sm:$0xff] }
  0x27   :  { %v878_v56 = vld [vmem:[%s1644_s4 + $0x188] sm:$0xff]  ;;  %v877_v60 = vld [vmem:[%s1644_s4 + $0x180] sm:$0xff]  ;;  %v888_v7 = vld [vmem:[%s1644_s4 + $0x1d8] sm:$0xff] }
  0x28   :  { %v882_v62 = vld [vmem:[%s1644_s4 + $0x1a8] sm:$0xff]  ;;  %v885_v10 = vld [vmem:[%s1644_s4 + $0x1c0] sm:$0xff]  ;;  %v887_v11 = vld [vmem:[%s1644_s4 + $0x1d0] sm:$0xff] }
  0x29   :  { %1020 = vmatpush3.bf16.msra.mxu0 %v1019_v2  ;;  %v891_v17 = vld [vmem:[%s1644_s4 + $0x1f0] sm:$0xff]  ;;  %v713_v20 = vld [vmem:[%s1646_s7 + $0x60] sm:$0xff]  ;;  %v716_v26 = vld [vmem:[%s1646_s7 + $0x78] sm:$0xff] }
  0x2a   :  { %1086 = vmatprep.subr.bf16.mxu0 %v1085_v29  ;;  %v855_v29 = vld [vmem:[%s1644_s4 + $0xe0] sm:$0xff]  ;;  %v731_v23 = vld [vmem:[%s1646_s7 + $0xf0] sm:$0xff] }
  0x2b   :  { %v715_v25 = vld [vmem:[%s1646_s7 + $0x70] sm:$0xff] }
  0x2c   :  { %981 = vmatmul.mubr.msk.f32.vlgmr.msra.gmra.mrb[2].mxu0 %vm86_vm3, %v42_v4 }
  0x2d   :  { %1088 = vmatpush3.bf16.msra.mxu0 %v1087_v33  ;;  %v1051_v33 = vpack.c.bf16 %v857_v30, %v855_v29 }
  0x2e   :  { %1090 = vmatprep.subr.bf16.mxu0 %v1089_v34  ;;  %v1053_v34 = vpack.c.bf16 %v863_v32, %v861_v31  ;;  %v233_v31 = vld [vmem:[%s1648_s6] sm:$0x3] }
  0x31   :  { %1092 = vmatpush3.bf16.msra.mxu0 %v1091_v39  ;;  %v1055_v39 = vpack.c.bf16 %v862_v36, %v860_v35 }
  0x32   :  { %1094 = vmatprep.subr.bf16.mxu0 %v1093_v40 }
  0x35   :  { %1096 = vmatpush3.bf16.msra.mxu0 %v1095_v45  ;;  %v871_v45 = vld [vmem:[%s1644_s4 + $0x158] sm:$0xff] }
  0x36   :  { %1098 = vmatprep.subr.bf16.mxu0 %v1097_v46  ;;  %v1059_v46 = vpack.c.bf16 %v866_v43, %v864_v42  ;;  %v1061_v47 = vpack.c.bf16 %v871_v45, %v869_v44  ;;  %v894_v43 = vld [vmem:[%s1650_s8] ss:$0 sm:$0xff] }
  0x39   :  { %1100 = vmatpush3.bf16.msra.mxu0 %v1099_v51  ;;  %v875_v51 = vld [vmem:[%s1644_s4 + $0x178] sm:$0xff] }
  0x3a   :  { %1102 = vmatprep.subr.bf16.mxu0 %v1101_v52  ;;  %v1063_v52 = vpack.c.bf16 %v870_v49, %v868_v48  ;;  %v1065_v53 = vpack.c.bf16 %v875_v51, %v873_v50 }
  0x3d   :  { %1104 = vmatpush3.bf16.msra.mxu0 %v1103_v57  ;;  %v880_v57 = vld [vmem:[%s1644_s4 + $0x198] sm:$0xff] }
  0x3e   :  { %1106 = vmatprep.subr.bf16.mxu0 %v1105_v58  ;;  %v1067_v58 = vpack.c.bf16 %v874_v55, %v872_v54  ;;  %v1069_v59 = vpack.c.bf16 %v880_v57, %v878_v56 }
  0x41   :  { %1108 = vmatpush3.bf16.msra.mxu0 %v1107_v63  ;;  %v884_v63 = vld [vmem:[%s1644_s4 + $0x1b8] sm:$0xff] }
  0x42   :  { %1110 = vmatprep.subr.bf16.mxu0 %v1109_v0  ;;  %v1071_v0 = vpack.c.bf16 %v879_v61, %v877_v60 }
  0xf7   :  { %v929_v1 = vpop.f32.mrb[0].mxu0 }
  0xf8   :  { %v930_v2 = vpop.f32.mrb[1].mxu0 }
  0xf9   :  { %v931_v4 = vadd.f32 %v930_v2, %v929_v1  ;;  %v1073_v2 = vpack.c.bf16 %v884_v63, %v882_v62 }
  0xfb   :  { %v157_v6 = vadd.f32 %v931_v4, %v837_v5  ;;  %v881_v4 = vld [vmem:[%s1644_s4 + $0x1a0] sm:$0xff]  ;;  %v883_v5 = vld [vmem:[%s1644_s4 + $0x1b0] sm:$0xff] }
  0xfc   :  { %v1075_v8 = vpack.c.bf16 %v883_v5, %v881_v4 }
  0xff   :  { %v226_v9 = vpop.f32.mrb[2].mxu0 }
 0x100   :  { %v227_v12 = vadd.f32 %v226_v9, %v157_v6  ;;  %v982_v13 = vpop.f32.mrb[3].mxu0  ;;  %v886_v6 = vld [vmem:[%s1644_s4 + $0x1c8] sm:$0xff] }
 0x101   :  { %v1077_v9 = vpack.c.bf16 %v888_v7, %v886_v6  ;;  %v892_v13 = vld [vmem:[%s1644_s4 + $0x1f8] sm:$0xff] }
 0x102   :  { %v1469_v15 = vmax.f32 %v227_v12, 0.0  ;;  %v890_v12 = vld [vmem:[%s1644_s4 + $0x1e8] sm:$0xff] }
 0x104   :  { %842 = vmatmul.mubr.msk.f32.vlgmr.msra.gmra.mrb[0].mxu1 %vm343_vm4, %v1469_v15  ;;  %v437_v40 = vrot.slane %v1469_v15, 2  ;;  %v530_v1 = vrot.slane %v1469_v15, 4  ;;  %v623_v19 = vrot.slane %v1469_v15, 6  ;;  %v732_v15 = vld [vmem:[%s1646_s7 + $0xf8] sm:$0xff] }
 0x105   :  { %1040 = vmatpush1.bf16.msra.mxu1 %v1039_v14  ;;  %504 = vmatprep.mubr.f32.mxu1 %v1131_v3  ;;  %v1081_v14 = vpack.c.bf16 %v892_v13, %v890_v12  ;;  %v1113_v24 = vpack.c.bf16 %v732_v15, %v731_v23 }
 0x106   :  { %1042 = vmatprep.subr.bf16.mxu1 %v1041_v16  ;;  %v889_v16 = vld [vmem:[%s1644_s4 + $0x1e0] sm:$0xff] }
 0x107   :  { %v1083_v18 = vpack.c.bf16 %v891_v17, %v889_v16 }
 0x109   :  { %1044 = vmatpush1.bf16.msra.mxu1 %v1043_v21  ;;  %v714_v21 = vld [vmem:[%s1646_s7 + $0x68] sm:$0xff] }
 0x10a   :  { %1046 = vmatprep.subr.bf16.mxu1 %v1045_v22  ;;  %v1111_v22 = vpack.c.bf16 %v714_v21, %v713_v20 }
 0x10c   :  { %1112 = vmatpush3.bf16.msra.mxu0 %v1111_v22 }
 0x10d   :  { %1048 = vmatpush1.bf16.msra.mxu1 %v1047_v27  ;;  %v1115_v27 = vpack.c.bf16 %v716_v26, %v715_v25  ;;  %1114 = vmatprep.subr.bf16.mxu0 %v1113_v24 }
 0x10e   :  { %1050 = vmatprep.subr.bf16.mxu1 %v1049_v28  ;;  %v235_v28 = vlaneseq }
 0x110   :  { %1116 = vmatpush3.bf16.msra.mxu0 %v1115_v27  ;;  %v236_v29 = vshrl.u32 %v235_v28, 7 }
 0x111   :  { %1052 = vmatpush1.bf16.msra.mxu1 %v1051_v33 }
 0x112   :  { %1054 = vmatprep.subr.bf16.mxu1 %v1053_v34  ;;  %v237_v30 = vsub.s32 0, %v236_v29  ;;  %v241_v32 = vsub.s32 1, %v236_v29 }
 0x114   :  { %859 = vmatmul.mubr.msk.f32.vlgmr.msra.gmra.mrb[0].mxu1 %vm343_vm4, %v437_v40  ;;  %v238_v33 = vrot.slane %v233_v31, %v237_v30  ;;  %v242_v34 = vrot.slane %v233_v31, %v241_v32 }
 0x115   :  { %1056 = vmatpush1.bf16.msra.mxu1 %v1055_v39  ;;  %597 = vmatprep.mubr.f32.mxu1 %v1131_v3 }
 0x116   :  { %1058 = vmatprep.subr.bf16.mxu1 %v1057_v41  ;;  %v16_v41 = vstv %s1649_s10 }
 0x117   :  { %17 = vst [vmem:[#allocation2] sm:$0x1] %v16_v41 }
 0x119   :  { %1060 = vmatpush1.bf16.msra.mxu1 %v1059_v46 }
 0x11a   :  { %1062 = vmatprep.subr.bf16.mxu1 %v1061_v47  ;;  %v895_v47 = vld [vmem:[%s1651_s9] ss:$0 sm:$0xff] }
 0x11d   :  { %1064 = vmatpush1.bf16.msra.mxu1 %v1063_v52 }
 0x11e   :  { %1066 = vmatprep.subr.bf16.mxu1 %v1065_v53  ;;  %v896_v51 = vld [vmem:[#allocation2] ss:$0 sm:$0xff] }
 0x121   :  { %1068 = vmatpush1.bf16.msra.mxu1 %v1067_v58 }
 0x122   :  { %1070 = vmatprep.subr.bf16.mxu1 %v1069_v59 }
 0x124   :  { %876 = vmatmul.mubr.msk.f32.vlgmr.msra.gmra.mrb[0].mxu1 %vm343_vm4, %v530_v1 }
 0x125   :  { %1072 = vmatpush1.bf16.msra.mxu1 %v1071_v0  ;;  %690 = vmatprep.mubr.f32.mxu1 %v1131_v3  ;;  %v1079_v3 = vpack.c.bf16 %v887_v11, %v885_v10 }
 0x126   :  { %1074 = vmatprep.subr.bf16.mxu1 %v1073_v2 }
 0x129   :  { %1076 = vmatpush1.bf16.msra.mxu1 %v1075_v8 }
 0x12a   :  { %1078 = vmatprep.subr.bf16.mxu1 %v1077_v9 }
 0x12d   :  { %1080 = vmatpush1.bf16.msra.mxu1 %v1079_v3 }
 0x12e   :  { %1082 = vmatprep.subr.bf16.mxu1 %v1081_v14 }
 0x131   :  { %1084 = vmatpush1.bf16.msra.mxu1 %v1083_v18 }
 0x134   :  { %893 = vmatmul.mubr.msk.f32.vlgmr.msra.gmra.mrb[0].mxu1 %vm343_vm4, %v623_v19 }
 0x207   :  { %v692_v35 = vpop.f32.mrb[0].mxu1 }
 0x208   :  { %v1117_v36 = vadd.f32 %v692_v35, %v238_v33  ;;  %v694_v37 = vpop.f32.mrb[1].mxu1 }
 0x209   :  { %v1118_v38 = vadd.f32 %v694_v37, %v242_v34 }
 0x20a   :  { %v699_v40 = vmax.f32 %v1117_v36, 0.0 }
 0x20b   :  { %v700_v39 = vmax.f32 %v1118_v38, 0.0 }
 0x20d   :  { %804 = vmatprep.mubr.f32.mxu0 %v700_v39 }
 0x20e   :  { %805 = vmatmul.mubr.f32.vlgmr.msra.gmra.mrb[4].mxu0 %v699_v40 }
 0x2e1   :  { %v969_v42 = vpop.f32.mrb[4].mxu0 }
 0x2e2   :  { %v970_v44 = vpop.f32.mrb[5].mxu0 }
 0x2e3   :  { %v971_v45 = vadd.f32 %v970_v44, %v969_v42 }
 0x2e5   :  { %v807_v46 = vadd.f32 %v971_v45, %v894_v43 }
 0x2e7   :  { %v810_v48 = vmax.f32 %v807_v46, 0.0 }
 0x2e9   :  { %v818_v49 = vmul.f32 %v895_v47, %v810_v48 }
 0x2eb   :  { %v820_v50 = vsel %vm819_vm5, %v818_v49, 0.0 }
 0x2ec   :  { %821 = vadd.xlane.f32.xlu0 %v820_v50 }
 0x379   :  { %v822_v52 = vpop.xlane.xlu0 %821 }
 0x37a   :  { %v830_v53 = vadd.f32 %v896_v51, %v822_v52 }
 0x37c   :  { %832 = vst.msk [vmem:[%s1652_s11] sm:$0x3] %vm831_vm6, %v830_v53 }

</bundles_post_ra>
